<compile_context>
chip_gen: v6e
topology: v6e:2x2x1
jax: 0.10.0
libtpu: 0.0.40
codegen_flags: <defaults>
</compile_context>

<pallas_src>
import jax
import jax.numpy as jnp
from jax.experimental import pallas as pl
from jax.experimental.pallas import tpu as pltpu


def _round_up(x, m):
    return (x + m - 1) // m * m


def build_el_forward(B, L, D_in, C, ent_dim, filter_sizes, n_filters, en_dim,
                     b_tile=None, compute_dtype=jnp.float32):
    nfs = len(filter_sizes)
    total_f = nfs * n_filters
    max_fs = max(filter_sizes)
    assert all(fs <= L for fs in filter_sizes), "filter size exceeds sequence length"

    L_pad = L + max_fs - 1                   # zero-pad time so every tap slices cleanly
    Kc = max_fs * D_in                       # fused-tap contraction dim
    Kc_pad = _round_up(Kc, 128)
    F_pad = _round_up(total_f, 128)          # conv-feature lanes
    E_pad = _round_up(en_dim, 128)           # mention lanes
    C_sc = _round_up(C, 128)                 # candidate/score lanes (lane-dense output)
    S = max(F_pad, E_pad)                    # packed bias-slab width

    dtype_bytes = jnp.dtype(compute_dtype).itemsize

    if b_tile is None:
        b8 = _round_up(B, 8)
        b_tile = min(128, b8)
        # v7x has 2 TensorCores: prefer >= 2 parallel batch tiles when possible.
        if b8 >= 16:
            b_tile = min(b_tile, _round_up((b8 + 1) // 2, 8))
        # VMEM budget for double-buffered streamed tiles (v7x-safe: ~24 MiB).
        bytes_per_row = ((L_pad * D_in + C_sc * ent_dim) * dtype_bytes
                         + (C_sc + 128) * 4)
        max_rows = max(8, ((24 << 20) // max(1, 2 * bytes_per_row)) // 8 * 8)
        b_tile = max(8, min(b_tile, max_rows))
    assert b_tile % 8 == 0
    B_pad = _round_up(B, b_tile)
    n_b_tiles = B_pad // b_tile

    def kernel(x_ref, cand_ref, w_ref, wm_ref, wet_ref, mask_ref, bias_ref,
               scores_ref, noise_ref):
        # ---- unpack the packed bias/param slab (resident in VMEM) ----------
        cb = bias_ref[0:1, :F_pad]           # (1, F_pad) conv biases (lane-padded w/ 0)
        bm = bias_ref[1:2, :E_pad]           # (1, E_pad) mention bias
        be = bias_ref[2:3, :E_pad]           # (1, E_pad) entity-proj bias
        wn = bias_ref[3:4, :E_pad]           # (1, E_pad) noise weight (row)
        bn = bias_ref[4:5, 0:1]              # (1, 1)     noise bias

        # ---- CNN text encoder: fused-tap im2col -> ONE MXU matmul ----------
        x = x_ref[...]                       # (b_tile, L_pad, D_in)
        taps = [x[:, k:k + L, :] for k in range(max_fs)]
        if Kc_pad > Kc:
            taps.append(jnp.zeros((b_tile, L, Kc_pad - Kc), x.dtype))
        xt = jnp.concatenate(taps, axis=-1)                 # (b_tile, L, Kc_pad)
        conv = jnp.dot(xt.reshape(b_tile * L, Kc_pad), w_ref[...],
                       preferred_element_type=jnp.float32)  # (b_tile*L, F_pad)
        conv = conv.reshape(b_tile, L, F_pad) + cb.reshape(1, 1, F_pad)
        # Post-ReLU values are >= 0, so multiplying by the precomputed 0/1
        # validity mask (hoisted to the wrapper) preserves the time-max exactly.
        conv = jnp.maximum(conv, 0.0) * mask_ref[...][None, :, :]
        feat = jnp.max(conv, axis=1)                        # (b_tile, F_pad)

        # ---- mention representation ----------------------------------------
        m = jnp.maximum(
            jnp.dot(feat.astype(compute_dtype), wm_ref[...],
                    preferred_element_type=jnp.float32) + bm, 0.0)  # (b_tile, E_pad)

        # ---- candidate scoring (re-associated): cand . (m @ We^T) + <be, m> -
        p = jnp.dot(m.astype(compute_dtype), wet_ref[...],
                    preferred_element_type=jnp.float32)     # (b_tile, ent_dim)
        bias_m = jnp.sum(m * be, axis=-1, keepdims=True)    # (b_tile, 1)
        scores = jnp.sum(cand_ref[...] * p[:, None, :], axis=-1) + bias_m
        scores_ref[...] = scores                            # (b_tile, C_sc), full-width vst

        # ---- noise head: VPU mul + lane reduce ------------------------------
        noise = jnp.sum(m * wn, axis=-1, keepdims=True) + bn  # (b_tile, 1)
        noise_ref[...] = jnp.broadcast_to(noise, (b_tile, 128))

    grid_spec = pltpu.PrefetchScalarGridSpec(
        num_scalar_prefetch=0,
        grid=(n_b_tiles,),
        in_specs=[
            pl.BlockSpec((b_tile, L_pad, D_in), lambda b: (b, 0, 0)),   # ctx
            pl.BlockSpec((b_tile, C_sc, ent_dim), lambda b: (b, 0, 0)),  # cands
            pl.BlockSpec((Kc_pad, F_pad), lambda b: (0, 0)),             # fused conv W
            pl.BlockSpec((F_pad, E_pad), lambda b: (0, 0)),              # W_mention
            pl.BlockSpec((E_pad, ent_dim), lambda b: (0, 0)),            # W_ent^T
            pl.BlockSpec((L, F_pad), lambda b: (0, 0)),                  # validity mask
            pl.BlockSpec((8, S), lambda b: (0, 0)),                      # bias slab
        ],
        out_specs=[
            pl.BlockSpec((b_tile, C_sc), lambda b: (b, 0)),              # scores
            pl.BlockSpec((b_tile, 128), lambda b: (b, 0)),               # noise
        ],
    )

    # Explicit scoped-VMEM budget (estimate * headroom, clamped to [32, 64] MiB).
    stream_bytes = b_tile * (L_pad * D_in + C_sc * ent_dim) * dtype_bytes
    weight_bytes = ((Kc_pad * F_pad + F_pad * E_pad + E_pad * ent_dim) * dtype_bytes
                    + (L * F_pad + 8 * S) * 4)
    out_bytes = b_tile * (C_sc + 128) * 4
    est = 2 * (stream_bytes + out_bytes + weight_bytes)
    vmem_limit = int(min(64 << 20, max(32 << 20, 3 * est)))

    call = pl.pallas_call(
        kernel,
        grid_spec=grid_spec,
        out_shape=(jax.ShapeDtypeStruct((B_pad, C_sc), jnp.float32),
                   jax.ShapeDtypeStruct((B_pad, 128), jnp.float32)),
        compiler_params=pltpu.CompilerParams(
            dimension_semantics=("parallel",),
            vmem_limit_bytes=vmem_limit),
    )

    def forward(x_emb, cand_embs, conv_w, conv_b, wm, bm, we, be, wn, bn):
        f32 = jnp.float32

        # Fused conv weight: row k*D_in + d, col f  <-  conv_w[fs_group][k, d, f].
        # Taps beyond a filter's size (and K padding rows) stay zero.
        w_flat = jnp.zeros((Kc_pad, F_pad), f32)
        for i, fs in enumerate(filter_sizes):
            w_i = jnp.asarray(conv_w[i], f32).reshape(fs * D_in, n_filters)
            w_flat = w_flat.at[:fs * D_in, i * n_filters:(i + 1) * n_filters].set(w_i)

        # Time-validity mask per filter-size group (hoisted out of the kernel).
        mask = jnp.zeros((L, F_pad), f32)
        for i, fs in enumerate(filter_sizes):
            mask = mask.at[:L - fs + 1, i * n_filters:(i + 1) * n_filters].set(1.0)

        # Lane-padded weights.
        wm_p = jnp.zeros((F_pad, E_pad), f32).at[:total_f, :en_dim].set(
            jnp.asarray(wm, f32))
        wet_p = jnp.zeros((E_pad, ent_dim), f32).at[:en_dim, :].set(
            jnp.asarray(we, f32).T)

        # Packed small parameters: one lane-dense (8, S) slab, one DMA.
        bias = jnp.zeros((8, S), f32)
        bias = bias.at[0, :total_f].set(
            jnp.concatenate([jnp.asarray(b, f32).reshape(-1) for b in conv_b]))
        bias = bias.at[1, :en_dim].set(jnp.asarray(bm, f32).reshape(-1))
        bias = bias.at[2, :en_dim].set(jnp.asarray(be, f32).reshape(-1))
        bias = bias.at[3, :en_dim].set(jnp.asarray(wn, f32).reshape(-1))
        bias = bias.at[4, 0].set(jnp.asarray(bn, f32).reshape(-1)[0])

        # Pad batch (to the tile), time (for the taps), candidates (to 128 lanes).
        x_p = jnp.zeros((B_pad, L_pad, D_in), compute_dtype)
        x_p = x_p.at[:B, :L, :].set(jnp.asarray(x_emb, compute_dtype))
        cand_p = jnp.zeros((B_pad, C_sc, ent_dim), compute_dtype)
        cand_p = cand_p.at[:B, :C, :].set(jnp.asarray(cand_embs, compute_dtype))

        scores_full, noise_full = call(
            x_p, cand_p,
            w_flat.astype(compute_dtype),
            wm_p.astype(compute_dtype),
            wet_p.astype(compute_dtype),
            mask, bias)
        return scores_full[:B, :C], noise_full[:B, :1]

    return forward


def reference_forward(x_emb, cand, conv_w, conv_b, wm, bm, we, be, wn, bn,
                      filter_sizes):
    B, L, _ = x_emb.shape
    feats = []
    for i, fs in enumerate(filter_sizes):
        out_len = L - fs + 1
        acc = jnp.zeros((B, out_len, conv_w[i].shape[-1]), jnp.float32)
        for k in range(fs):
            acc = acc + jnp.einsum("bld,df->blf", x_emb[:, k:k + out_len, :],
                                   conv_w[i][k])
        acc = jnp.maximum(acc + conv_b[i][None], 0.0)
        feats.append(jnp.max(acc, axis=1))
    feat = jnp.concatenate(feats, axis=1)
    m = jnp.maximum(feat @ wm + bm, 0.0)
    e = jnp.einsum("bcd,de->bce", cand, we) + be[None]
    scores = jnp.einsum("be,bce->bc", m, e)
    noise = m @ wn + bn
    return scores, noise


if __name__ == "__main__":
    # small synthetic config consistent with EL(config)
    B, L, C = 2, 8, 6                 # batch, context length, candidates
    vocab, word_dim = 50, 16
    pos_embdim = 8
    ent_embdim = 24
    filter_sizes = (2, 3)
    n_filters = 12
    en_dim = 32
    D_in = word_dim + pos_embdim
    total_f = n_filters * len(filter_sizes)

    key = jax.random.PRNGKey(0)
    ks = jax.random.split(key, 16)

    # deterministic "pretrained" tables & parameters
    word_embs = 0.1 * jax.random.normal(ks[0], (vocab, word_dim), jnp.float32)
    pos_embs = 0.1 * jax.random.normal(ks[1], (2 * L + 1, pos_embdim), jnp.float32)
    conv_w = [0.1 * jax.random.normal(ks[2 + i], (fs, D_in, n_filters), jnp.float32)
              for i, fs in enumerate(filter_sizes)]
    conv_b = [0.1 * jax.random.normal(ks[4 + i], (1, n_filters), jnp.float32)
              for i in range(len(filter_sizes))]
    wm = 0.1 * jax.random.normal(ks[6], (total_f, en_dim), jnp.float32)
    bm = 0.1 * jax.random.normal(ks[7], (1, en_dim), jnp.float32)
    we = 0.1 * jax.random.normal(ks[8], (ent_embdim, en_dim), jnp.float32)
    be = 0.1 * jax.random.normal(ks[9], (1, en_dim), jnp.float32)
    wn = 0.1 * jax.random.normal(ks[10], (en_dim, 1), jnp.float32)
    bn = 0.1 * jax.random.normal(ks[11], (1, 1), jnp.float32)

    # inputs
    word_ids = jax.random.randint(ks[12], (B, L), 0, vocab)
    pos_ids = jax.random.randint(ks[13], (B, L), 0, 2 * L + 1)
    cand_embs = 0.1 * jax.random.normal(ks[14], (B, C, ent_embdim), jnp.float32)

    # glue: embedding lookups stay in plain JAX
    x_emb = jnp.concatenate([word_embs[word_ids], pos_embs[pos_ids]], axis=-1)

    ref_scores, ref_noise = reference_forward(x_emb, cand_embs, conv_w, conv_b,
                                              wm, bm, we, be, wn, bn,
                                              filter_sizes)

    # exact f32 path (v5e-friendly, tight tolerance)
    el_fwd_f32 = build_el_forward(B, L, D_in, C, ent_embdim, filter_sizes,
                                  n_filters, en_dim,
                                  compute_dtype=jnp.float32)
    scores, noise_scores = el_fwd_f32(x_emb, cand_embs, conv_w, conv_b,
                                      wm, bm, we, be, wn, bn)
    jax.block_until_ready((scores, noise_scores))
    assert scores.shape == (B, C) and noise_scores.shape == (B, 1)
    assert jnp.allclose(scores, ref_scores, atol=2e-3, rtol=2e-3)
    assert jnp.allclose(noise_scores, ref_noise, atol=2e-3, rtol=2e-3)

    # bf16 streaming/matmul path (v6e/v7x perf path, looser tolerance)
    el_fwd_bf16 = build_el_forward(B, L, D_in, C, ent_embdim, filter_sizes,
                                   n_filters, en_dim,
                                   compute_dtype=jnp.bfloat16)
    scores16, noise16 = el_fwd_bf16(x_emb, cand_embs, conv_w, conv_b,
                                    wm, bm, we, be, wn, bn)
    jax.block_until_ready((scores16, noise16))
    assert scores16.shape == (B, C) and noise16.shape == (B, 1)
    assert jnp.allclose(scores16, ref_scores, atol=2e-2, rtol=2e-2)
    assert jnp.allclose(noise16, ref_noise, atol=2e-2, rtol=2e-2)

    print("KERNEL_OK")
</pallas_src>

<mosaic_0001>
module attributes {stable_mosaic.version = 11 : i64} {
  func.func @kernel(%arg0: i32, %arg1: memref<8x10x24xf32, #tpu.memory_space<vmem>>, %arg2: memref<8x128x24xf32, #tpu.memory_space<vmem>>, %arg3: memref<128x128xf32, #tpu.memory_space<vmem>>, %arg4: memref<128x128xf32, #tpu.memory_space<vmem>>, %arg5: memref<128x24xf32, #tpu.memory_space<vmem>>, %arg6: memref<8x128xf32, #tpu.memory_space<vmem>>, %arg7: memref<8x128xf32, #tpu.memory_space<vmem>>, %arg8: memref<8x128xf32, #tpu.memory_space<vmem>>, %arg9: memref<8x128xf32, #tpu.memory_space<vmem>>) attributes {dimension_semantics = [#tpu.dimension_semantics<parallel>], iteration_bounds = array<i64: 1>, scalar_prefetch = 0 : i64, scratch_operands = 0 : i64, tpu.core_type = #tpu.core_type<tc>, window_params = [{transform_indices = @transform_0, window_bounds = array<i64: 8, 10, 24>}, {transform_indices = @transform_1, window_bounds = array<i64: 8, 128, 24>}, {pipeline_mode = #tpu.pipeline_mode<synchronous>, transform_indices = @transform_2, window_bounds = array<i64: 128, 128>}, {pipeline_mode = #tpu.pipeline_mode<synchronous>, transform_indices = @transform_3, window_bounds = array<i64: 128, 128>}, {pipeline_mode = #tpu.pipeline_mode<synchronous>, transform_indices = @transform_4, window_bounds = array<i64: 128, 24>}, {pipeline_mode = #tpu.pipeline_mode<synchronous>, transform_indices = @transform_5, window_bounds = array<i64: 8, 128>}, {pipeline_mode = #tpu.pipeline_mode<synchronous>, transform_indices = @transform_6, window_bounds = array<i64: 8, 128>}, {transform_indices = @transform_7, window_bounds = array<i64: 8, 128>}, {transform_indices = @transform_8, window_bounds = array<i64: 8, 128>}]} {
    %c0 = arith.constant 0 : index
    %c0_0 = arith.constant 0 : index
    %0 = vector.load %arg7[%c0, %c0_0] : memref<8x128xf32, #tpu.memory_space<vmem>>, vector<1x128xf32>
    %c1 = arith.constant 1 : index
    %c0_1 = arith.constant 0 : index
    %1 = vector.load %arg7[%c1, %c0_1] : memref<8x128xf32, #tpu.memory_space<vmem>>, vector<1x128xf32>
    %c2 = arith.constant 2 : index
    %c0_2 = arith.constant 0 : index
    %2 = vector.load %arg7[%c2, %c0_2] : memref<8x128xf32, #tpu.memory_space<vmem>>, vector<1x128xf32>
    %c3 = arith.constant 3 : index
    %c0_3 = arith.constant 0 : index
    %3 = vector.load %arg7[%c3, %c0_3] : memref<8x128xf32, #tpu.memory_space<vmem>>, vector<1x128xf32>
    %c4 = arith.constant 4 : index
    %c0_4 = arith.constant 0 : index
    %4 = vector.load %arg7[%c4, %c0_4] : memref<8x128xf32, #tpu.memory_space<vmem>>, vector<1x1xf32>
    %c0_5 = arith.constant 0 : index
    %c0_6 = arith.constant 0 : index
    %c0_7 = arith.constant 0 : index
    %5 = vector.load %arg1[%c0_5, %c0_6, %c0_7] : memref<8x10x24xf32, #tpu.memory_space<vmem>>, vector<8x10x24xf32>
    %6 = vector.extract_strided_slice %5 {offsets = [0, 0, 0], sizes = [8, 8, 24], strides = [1, 1, 1]} : vector<8x10x24xf32> to vector<8x8x24xf32>
    %7 = vector.extract_strided_slice %5 {offsets = [0, 1, 0], sizes = [8, 8, 24], strides = [1, 1, 1]} : vector<8x10x24xf32> to vector<8x8x24xf32>
    %8 = vector.extract_strided_slice %5 {offsets = [0, 2, 0], sizes = [8, 8, 24], strides = [1, 1, 1]} : vector<8x10x24xf32> to vector<8x8x24xf32>
    %cst = arith.constant 0.000000e+00 : f32
    %9 = vector.broadcast %cst : f32 to vector<8x8x56xf32>
    %10 = tpu.concatenate %6, %7, %8, %9 in 2 : vector<8x8x24xf32>, vector<8x8x24xf32>, vector<8x8x24xf32>, vector<8x8x56xf32> -> vector<8x8x128xf32>
    %11 = vector.shape_cast %10 : vector<8x8x128xf32> to vector<64x128xf32>
    %c0_8 = arith.constant 0 : index
    %c0_9 = arith.constant 0 : index
    %12 = vector.load %arg3[%c0_8, %c0_9] : memref<128x128xf32, #tpu.memory_space<vmem>>, vector<128x128xf32>
    %cst_10 = arith.constant dense<0.000000e+00> : vector<64x128xf32>
    %13 = tpu.matmul %11, %12, %cst_10 {dimension_numbers = #tpu.dot_dimension_numbers<[1], [0], [0], [1], [0, 0, 1, 1], [], []>} : vector<64x128xf32>, vector<128x128xf32>, vector<64x128xf32> -> vector<64x128xf32>
    %14 = vector.shape_cast %13 : vector<64x128xf32> to vector<8x8x128xf32>
    %15 = vector.shape_cast %0 : vector<1x128xf32> to vector<1x1x128xf32>
    %16 = vector.broadcast %15 : vector<1x1x128xf32> to vector<8x8x128xf32>
    %17 = arith.addf %14, %16 : vector<8x8x128xf32>
    %cst_11 = arith.constant 0.000000e+00 : f32
    %18 = vector.broadcast %cst_11 : f32 to vector<8x8x128xf32>
    %19 = arith.maximumf %17, %18 : vector<8x8x128xf32>
    %c0_12 = arith.constant 0 : index
    %c0_13 = arith.constant 0 : index
    %20 = vector.load %arg6[%c0_12, %c0_13] : memref<8x128xf32, #tpu.memory_space<vmem>>, vector<8x128xf32>
    %21 = vector.shape_cast %20 : vector<8x128xf32> to vector<1x8x128xf32>
    %22 = vector.broadcast %21 : vector<1x8x128xf32> to vector<8x8x128xf32>
    %23 = arith.mulf %19, %22 : vector<8x8x128xf32>
    %cst_14 = arith.constant dense<0xFF800000> : vector<8x128xf32>
    %24 = vector.multi_reduction <maximumf>, %23, %cst_14 [1] : vector<8x8x128xf32> to vector<8x128xf32>
    %c0_15 = arith.constant 0 : index
    %c0_16 = arith.constant 0 : index
    %25 = vector.load %arg4[%c0_15, %c0_16] : memref<128x128xf32, #tpu.memory_space<vmem>>, vector<128x128xf32>
    %cst_17 = arith.constant dense<0.000000e+00> : vector<8x128xf32>
    %26 = tpu.matmul %24, %25, %cst_17 {dimension_numbers = #tpu.dot_dimension_numbers<[1], [0], [0], [1], [0, 0, 1, 1], [], []>} : vector<8x128xf32>, vector<128x128xf32>, vector<8x128xf32> -> vector<8x128xf32>
    %27 = vector.broadcast %1 : vector<1x128xf32> to vector<8x128xf32>
    %28 = arith.addf %26, %27 : vector<8x128xf32>
    %cst_18 = arith.constant 0.000000e+00 : f32
    %29 = vector.broadcast %cst_18 : f32 to vector<8x128xf32>
    %30 = arith.maximumf %28, %29 : vector<8x128xf32>
    %c0_19 = arith.constant 0 : index
    %c0_20 = arith.constant 0 : index
    %31 = vector.load %arg5[%c0_19, %c0_20] : memref<128x24xf32, #tpu.memory_space<vmem>>, vector<128x24xf32>
    %cst_21 = arith.constant dense<0.000000e+00> : vector<8x24xf32>
    %32 = tpu.matmul %30, %31, %cst_21 {dimension_numbers = #tpu.dot_dimension_numbers<[1], [0], [0], [1], [0, 0, 1, 1], [], []>} : vector<8x128xf32>, vector<128x24xf32>, vector<8x24xf32> -> vector<8x24xf32>
    %33 = vector.broadcast %2 : vector<1x128xf32> to vector<8x128xf32>
    %34 = arith.mulf %30, %33 : vector<8x128xf32>
    %cst_22 = arith.constant dense<0.000000e+00> : vector<8xf32>
    %35 = vector.multi_reduction <add>, %34, %cst_22 [1] : vector<8x128xf32> to vector<8xf32>
    %36 = vector.shape_cast %35 : vector<8xf32> to vector<8x1xf32>
    %c0_23 = arith.constant 0 : index
    %c0_24 = arith.constant 0 : index
    %c0_25 = arith.constant 0 : index
    %37 = vector.load %arg2[%c0_23, %c0_24, %c0_25] : memref<8x128x24xf32, #tpu.memory_space<vmem>>, vector<8x128x24xf32>
    %38 = vector.shape_cast %32 : vector<8x24xf32> to vector<8x1x24xf32>
    %39 = vector.broadcast %38 : vector<8x1x24xf32> to vector<8x128x24xf32>
    %40 = arith.mulf %37, %39 : vector<8x128x24xf32>
    %cst_26 = arith.constant dense<0.000000e+00> : vector<8x128xf32>
    %41 = vector.multi_reduction <add>, %40, %cst_26 [2] : vector<8x128x24xf32> to vector<8x128xf32>
    %42 = vector.broadcast %36 : vector<8x1xf32> to vector<8x128xf32>
    %43 = arith.addf %41, %42 : vector<8x128xf32>
    %c0_27 = arith.constant 0 : index
    %c0_28 = arith.constant 0 : index
    %44 = vector.load %arg8[%c0_27, %c0_28] : memref<8x128xf32, #tpu.memory_space<vmem>>, vector<8x128xf32>
    tpu.vector_store %arg8[%c0_27, %c0_28], %43 {strides = array<i32>} : memref<8x128xf32, #tpu.memory_space<vmem>>, vector<8x128xf32>,
    %45 = vector.broadcast %3 : vector<1x128xf32> to vector<8x128xf32>
    %46 = arith.mulf %30, %45 : vector<8x128xf32>
    %cst_29 = arith.constant dense<0.000000e+00> : vector<8xf32>
    %47 = vector.multi_reduction <add>, %46, %cst_29 [1] : vector<8x128xf32> to vector<8xf32>
    %48 = vector.shape_cast %47 : vector<8xf32> to vector<8x1xf32>
    %49 = vector.broadcast %4 : vector<1x1xf32> to vector<8x1xf32>
    %50 = arith.addf %48, %49 : vector<8x1xf32>
    %51 = vector.shape_cast %50 : vector<8x1xf32> to vector<8x1xf32>
    %52 = vector.broadcast %51 : vector<8x1xf32> to vector<8x128xf32>
    %c0_30 = arith.constant 0 : index
    %c0_31 = arith.constant 0 : index
    %53 = vector.load %arg9[%c0_30, %c0_31] : memref<8x128xf32, #tpu.memory_space<vmem>>, vector<8x128xf32>
    tpu.vector_store %arg9[%c0_30, %c0_31], %52 {strides = array<i32>} : memref<8x128xf32, #tpu.memory_space<vmem>>, vector<8x128xf32>,
    return
  }
  func.func @transform_0(%arg0: i32) -> (i32, i32, i32) {
    %c0_i32 = arith.constant 0 : i32
    %c0_i32_0 = arith.constant 0 : i32
    %c0_i32_1 = arith.constant 0 : i32
    return %arg0, %c0_i32, %c0_i32_0 : i32, i32, i32
  }
  func.func @transform_1(%arg0: i32) -> (i32, i32, i32) {
    %c0_i32 = arith.constant 0 : i32
    %c0_i32_0 = arith.constant 0 : i32
    %c0_i32_1 = arith.constant 0 : i32
    return %arg0, %c0_i32, %c0_i32_0 : i32, i32, i32
  }
  func.func @transform_2(%arg0: i32) -> (i32, i32) {
    %c0_i32 = arith.constant 0 : i32
    %c0_i32_0 = arith.constant 0 : i32
    %c0_i32_1 = arith.constant 0 : i32
    return %c0_i32, %c0_i32_0 : i32, i32
  }
  func.func @transform_3(%arg0: i32) -> (i32, i32) {
    %c0_i32 = arith.constant 0 : i32
    %c0_i32_0 = arith.constant 0 : i32
    %c0_i32_1 = arith.constant 0 : i32
    return %c0_i32, %c0_i32_0 : i32, i32
  }
  func.func @transform_4(%arg0: i32) -> (i32, i32) {
    %c0_i32 = arith.constant 0 : i32
    %c0_i32_0 = arith.constant 0 : i32
    %c0_i32_1 = arith.constant 0 : i32
    return %c0_i32, %c0_i32_0 : i32, i32
  }
  func.func @transform_5(%arg0: i32) -> (i32, i32) {
    %c0_i32 = arith.constant 0 : i32
    %c0_i32_0 = arith.constant 0 : i32
    %c0_i32_1 = arith.constant 0 : i32
    return %c0_i32, %c0_i32_0 : i32, i32
  }
  func.func @transform_6(%arg0: i32) -> (i32, i32) {
    %c0_i32 = arith.constant 0 : i32
    %c0_i32_0 = arith.constant 0 : i32
    %c0_i32_1 = arith.constant 0 : i32
    return %c0_i32, %c0_i32_0 : i32, i32
  }
  func.func @transform_7(%arg0: i32) -> (i32, i32) {
    %c0_i32 = arith.constant 0 : i32
    %c0_i32_0 = arith.constant 0 : i32
    return %arg0, %c0_i32 : i32, i32
  }
  func.func @transform_8(%arg0: i32) -> (i32, i32) {
    %c0_i32 = arith.constant 0 : i32
    %c0_i32_0 = arith.constant 0 : i32
    return %arg0, %c0_i32 : i32, i32
  }
}

</mosaic_0001>

<bundles_post_ra>
// kernel: tpu_custom_call.1
= control target key start
LH: loop header
LB: loop body
LE: loop exit
PB: predicated region body
PF: predicated region fallthrough
CT: control target
= control target key end

     0   :  { %14 = vsyncpa [#allocation3], 0  ;;  %vm67_vm0 = vcmask 1046528   ;;  %s2966_s25 = smov 24   ;;  %s5090_s0 = inlined_call_operand.vmem [shape: f32[8,10,24], index: 0, kind: input, shape index: {}]   ;;  %s5091_s1 = inlined_call_operand.vmem [shape: f32[8,128,24], index: 1, kind: input, shape index: {}]   ;;  %s5092_s2 = inlined_call_operand.vmem [shape: f32[128,128], index: 2, kind: input, shape index: {}]   ;;  %s5093_s3 = inlined_call_operand.vmem [shape: f32[128,128], index: 3, kind: input, shape index: {}]   ;;  %s5094_s4 = inlined_call_operand.vmem [shape: f32[128,24], index: 4, kind: input, shape index: {}]   ;;  %s5095_s5 = inlined_call_operand.vmem [shape: f32[8,128], index: 5, kind: input, shape index: {}]   ;;  %s5096_s6 = inlined_call_operand.vmem [shape: f32[8,128], index: 6, kind: input, shape index: {}]   ;;  %s5097_s7 = inlined_call_operand.hbm [shape: f32[8,128], index: 7, kind: output, shape index: {0}]   ;;  %s5098_s8 = inlined_call_operand.hbm [shape: f32[8,128], index: 8, kind: output, shape index: {1}]  }
   0x1   :  { %v3022_v0 = vld [vmem:[%s5090_s0 + $0x20] sm:$0xff]  ;;  %v3027_v1 = vld [vmem:[%s5090_s0 + $0x28] sm:$0x3]  ;;  %v3045_v7 = vld [vmem:[%s5090_s0 + $0x30] sm:$0xff] }
   0x2   :  { %v3032_v2 = vld [vmem:[%s5090_s0] sm:$0xff]  ;;  %v74_v3 = vrot.slane %v3022_v0, 1  ;;  %v75_v4 = vrot.slane %v3027_v1, 1  ;;  %v3039_v5 = vld [vmem:[%s5090_s0 + $0x8] sm:$0x3]  ;;  %v77_v10 = vrot.slane %v3045_v7, 1 }
   0x3   :  { %v68_v6 = vrot.slane %v3032_v2, 1  ;;  %v69_v8 = vrot.slane %v3039_v5, 1  ;;  %v3051_v9 = vld [vmem:[%s5090_s0 + $0x38] sm:$0x3]  ;;  %v3057_v11 = vld [vmem:[%s5090_s0 + $0x10] sm:$0xff]  ;;  %v3080_v20 = vld [vmem:[%s5090_s0 + $0x40] sm:$0xff] }
   0x4   :  { %v3062_v12 = vld [vmem:[%s5090_s0 + $0x50] sm:$0xff]  ;;  %v76_v13 = vsel %vm67_vm0, %v74_v3, %v75_v4  ;;  %v78_v14 = vrot.slane %v3051_v9, 1  ;;  %v38_v15 = vld [vmem:[%s5090_s0 + $0x18] sm:$0x3]  ;;  %v71_v16 = vrot.slane %v3057_v11, 1  ;;  %v80_v26 = vrot.slane %v3080_v20, 1 }
   0x5   :  { %v3073_v17 = vld [vmem:[%s5090_s0 + $0x58] sm:$0x3]  ;;  %96 = vrot.lane.b32.xlu1 %v76_v13, %s2966_s25  ;;  %v70_v18 = vsel %vm67_vm0, %v68_v6, %v69_v8  ;;  %v72_v19 = vrot.slane %v38_v15, 1  ;;  %v3085_v21 = vld [vmem:[%s5090_s0 + $0x48] sm:$0x3]  ;;  %v83_v23 = vrot.slane %v3062_v12, 1 }
   0x6   :  { %92 = vrot.lane.b32.xlu0 %v70_v18, %s2966_s25  ;;  %v79_v22 = vsel %vm67_vm0, %v77_v10, %v78_v14  ;;  %v84_v24 = vrot.slane %v3073_v17, 1  ;;  %v81_v27 = vrot.slane %v3085_v21, 1  ;;  %v3097_v28 = vld [vmem:[%s5090_s0 + $0x70] sm:$0xff]  ;;  %v3102_v29 = vld [vmem:[%s5090_s0 + $0x78] sm:$0x3]  ;;  %v3110_v31 = vld [vmem:[%s5090_s0 + $0x60] sm:$0xff] }
   0x7   :  { %v73_v25 = vsel %vm67_vm0, %v71_v16, %v72_v19  ;;  %v207_v30 = vld [vmem:[%s5092_s2 + $0x78] sm:$0xff]  ;;  %v3115_v32 = vld [vmem:[%s5090_s0 + $0x68] sm:$0x3]  ;;  %v206_v33 = vld [vmem:[%s5092_s2 + $0x70] sm:$0xff]  ;;  %v89_v36 = vrot.slane %v3097_v28, 1  ;;  %v90_v37 = vrot.slane %v3102_v29, 1 }
   0x8   :  { %2798 = vmatprep.subr.mxu0 %v207_v30  ;;  %v205_v34 = vld [vmem:[%s5092_s2 + $0x68] sm:$0xff]  ;;  %v85_v35 = vsel %vm67_vm0, %v83_v23, %v84_v24  ;;  %v82_v38 = vsel %vm67_vm0, %v80_v26, %v81_v27  ;;  %v86_v39 = vrot.slane %v3110_v31, 1  ;;  %v87_v40 = vrot.slane %v3115_v32, 1  ;;  %v204_v41 = vld [vmem:[%s5092_s2 + $0x60] sm:$0xff]  ;;  %v203_v42 = vld [vmem:[%s5092_s2 + $0x58] sm:$0xff] }
   0x9   :  { %98 = vrot.lane.b32.xlu1 %v79_v22, %s2966_s25  ;;  %2799 = vmatpush3.msra.mxu0 %v207_v30 }
   0xa   :  { %94 = vrot.lane.b32.xlu0 %v73_v25, %s2966_s25  ;;  %2800 = vmatprep.subr.mxu0 %v206_v33 }
   0xb   :  { %2801 = vmatpush3.msra.mxu0 %v206_v33 }
   0xc   :  { %2802 = vmatprep.subr.mxu0 %v205_v34 }
   0xd   :  { %102 = vrot.lane.b32.xlu1 %v85_v35, %s2966_s25  ;;  %2803 = vmatpush3.msra.mxu0 %v205_v34 }
   0xe   :  { %15 = vsyncpa [#allocation5], 0  ;;  %100 = vrot.lane.b32.xlu0 %v82_v38, %s2966_s25  ;;  %v91_v43 = vsel %vm67_vm0, %v89_v36, %v90_v37  ;;  %v120_v44 = vrot.slane %v3057_v11, 2  ;;  %v121_v45 = vrot.slane %v38_v15, 2  ;;  %2804 = vmatprep.subr.mxu0 %v204_v41  ;;  %v88_v46 = vsel %vm67_vm0, %v86_v39, %v87_v40  ;;  %v202_v49 = vld [vmem:[%s5092_s2 + $0x50] sm:$0xff]  ;;  %v201_v50 = vld [vmem:[%s5092_s2 + $0x48] sm:$0xff] }
   0xf   :  { %vm116_vm1 = vcmask 1045504   ;;  %v117_v47 = vrot.slane %v3032_v2, 2  ;;  %v118_v48 = vrot.slane %v3039_v5, 2  ;;  %2805 = vmatpush3.msra.mxu0 %v204_v41  ;;  %v126_v52 = vrot.slane %v3045_v7, 2  ;;  %v200_v57 = vld [vmem:[%s5092_s2 + $0x40] sm:$0xff]  ;;  %v199_v58 = vld [vmem:[%s5092_s2 + $0x38] sm:$0xff] }
  0x10   :  { %2806 = vmatprep.subr.mxu0 %v203_v42  ;;  %v122_v51 = vsel %vm116_vm1, %v120_v44, %v121_v45  ;;  %v127_v53 = vrot.slane %v3051_v9, 2  ;;  %v123_v55 = vrot.slane %v3022_v0, 2  ;;  %v124_v56 = vrot.slane %v3027_v1, 2  ;;  %v198_v3 = vld [vmem:[%s5092_s2 + $0x30] sm:$0xff]  ;;  %v197_v4 = vld [vmem:[%s5092_s2 + $0x28] sm:$0xff]  ;;  %v196_v14 = vld [vmem:[%s5092_s2 + $0x20] sm:$0xff] }
  0x11   :  { %106 = vrot.lane.b32.xlu1 %v91_v43, %s2966_s25  ;;  %2807 = vmatpush3.msra.mxu0 %v203_v42  ;;  %v119_v54 = vsel %vm116_vm1, %v117_v47, %v118_v48  ;;  %v132_v60 = vrot.slane %v3062_v12, 2  ;;  %v133_v61 = vrot.slane %v3073_v17, 2  ;;  %v129_v63 = vrot.slane %v3080_v20, 2  ;;  %v195_v15 = vld [vmem:[%s5092_s2 + $0x18] sm:$0xff]  ;;  %v194_v18 = vld [vmem:[%s5092_s2 + $0x10] sm:$0xff]  ;;  %v193_v19 = vld [vmem:[%s5092_s2 + $0x8] sm:$0xff] }
  0x12   :  { %104 = vrot.lane.b32.xlu0 %v88_v46, %s2966_s25  ;;  %2808 = vmatprep.subr.mxu0 %v202_v49  ;;  %s2967_s25 = smov 48   ;;  %v128_v59 = vsel %vm116_vm1, %v126_v52, %v127_v53  ;;  %v125_v62 = vsel %vm116_vm1, %v123_v55, %v124_v56  ;;  %v130_v1 = vrot.slane %v3085_v21, 2  ;;  %v138_v6 = vrot.slane %v3097_v28, 2  ;;  %v192_v21 = vld [vmem:[%s5092_s2] sm:$0xff]  ;;  %v401_v53 = vld [vmem:[%s5093_s3 + $0x58] sm:$0xff]  ;;  %v399_v55 = vld [vmem:[%s5093_s3 + $0x48] sm:$0xff] }
  0x13   :  { %2809 = vmatpush3.msra.mxu0 %v202_v49  ;;  %v134_v5 = vsel %vm116_vm1, %v132_v60, %v133_v61  ;;  %v139_v8 = vrot.slane %v3102_v29, 2  ;;  %v135_v10 = vrot.slane %v3110_v31, 2  ;;  %v136_v13 = vrot.slane %v3115_v32, 2  ;;  %v402_v52 = vld [vmem:[%s5093_s3 + $0x60] sm:$0xff]  ;;  %v393_v61 = vld [vmem:[%s5093_s3 + $0x18] sm:$0xff] }
  0x14   :  { %2810 = vmatprep.subr.mxu0 %v201_v50  ;;  %v131_v9 = vsel %vm116_vm1, %v129_v63, %v130_v1  ;;  %vm165_vm2 = vcmask 195584   ;;  %vm174_vm3 = vcmask 392192   ;;  %vm183_vm4 = vcmask 588800   ;;  %v398_v56 = vld [vmem:[%s5093_s3 + $0x40] sm:$0xff]  ;;  %v391_v63 = vld [vmem:[%s5093_s3 + $0x8] sm:$0xff] }
  0x15   :  { %143 = vrot.lane.b32.xlu1 %v122_v51, %s2967_s25  ;;  %2811 = vmatpush3.msra.mxu0 %v201_v50  ;;  %v140_v16 = vsel %vm116_vm1, %v138_v6, %v139_v8  ;;  %v137_v17 = vsel %vm116_vm1, %v135_v10, %v136_v13  ;;  %v2968_v50 = vmov 0.0   ;;  %v403_v51 = vld [vmem:[%s5093_s3 + $0x68] sm:$0xff]  ;;  %v394_v60 = vld [vmem:[%s5093_s3 + $0x20] sm:$0xff]  ;;  %vm2969_vm5 = vmmov 0   ;;  %v515_v8 = vld [vmem:[%s5094_s4 + $0x58] sm:$0xff] }
  0x16   :  { %141 = vrot.lane.b32.xlu0 %v119_v54, %s2967_s25  ;;  %2812 = vmatprep.subr.mxu0 %v200_v57  ;;  %v400_v54 = vld [vmem:[%s5093_s3 + $0x50] sm:$0xff]  ;;  %v390_v1 = vld [vmem:[%s5093_s3] sm:$0xff]  ;;  %v513_v10 = vld [vmem:[%s5094_s4 + $0x48] sm:$0xff]  ;;  %vm418_vm6 = vcmask 1041409   ;;  %vm420_vm7 = vcmask 1042434   ;;  %vm5104_vm8 = vcmask 1043459  }
  0x17   :  { %2813 = vmatpush3.msra.mxu0 %v200_v57  ;;  %2842 = vmatprep.subr.mxu1 %v2968_v50  ;;  %v397_v57 = vld [vmem:[%s5093_s3 + $0x38] sm:$0xff]  ;;  %v516_v6 = vld [vmem:[%s5094_s4 + $0x60] sm:$0xff]  ;;  %vm5103_vm9 = vcmask 1044484   ;;  %vm5102_vm10 = vcmask 1045509   ;;  %vm5101_vm11 = vcmask 1046534   ;;  %vm5100_vm12 = vcmask 1047559  }
  0x18   :  { %2814 = vmatprep.subr.mxu0 %v199_v58  ;;  %2874 = vmatprep.mubr.msk.f32.mxu1 %vm2969_vm5, %v2968_v50  ;;  %v512_v13 = vld [vmem:[%s5094_s4 + $0x40] sm:$0xff]  ;;  %vm2019_vm13 = vcmask 130112   ;;  %vm2026_vm14 = vcmask 195712   ;;  %vm2033_vm15 = vcmask 261312   ;;  %vm2040_vm0 = vcmask 326912  }
  0x19   :  { %147 = vrot.lane.b32.xlu1 %v128_v59, %s2967_s25  ;;  %2815 = vmatpush3.msra.mxu0 %v199_v58  ;;  %v396_v58 = vld [vmem:[%s5093_s3 + $0x30] sm:$0xff]  ;;  %v395_v59 = vld [vmem:[%s5093_s3 + $0x28] sm:$0xff]  ;;  %vm2047_vm1 = vcmask 392512  }
  0x1a   :  { %145 = vrot.lane.b32.xlu0 %v125_v62, %s2967_s25  ;;  %2816 = vmatprep.subr.mxu0 %v198_v3  ;;  %v392_v62 = vld [vmem:[%s5093_s3 + $0x10] sm:$0xff] }
  0x1b   :  { %2817 = vmatpush3.msra.mxu0 %v198_v3  ;;  %v519_v3 = vld [vmem:[%s5094_s4 + $0x78] sm:$0xff] }
  0x1c   :  { %2818 = vmatprep.subr.mxu0 %v197_v4 }
  0x1d   :  { %151 = vrot.lane.b32.xlu1 %v134_v5, %s2967_s25  ;;  %2819 = vmatpush3.msra.mxu0 %v197_v4  ;;  %v518_v4 = vld [vmem:[%s5094_s4 + $0x70] sm:$0xff]  ;;  %v517_v5 = vld [vmem:[%s5094_s4 + $0x68] sm:$0xff] }
  0x1e   :  { %149 = vrot.lane.b32.xlu0 %v131_v9, %s2967_s25  ;;  %2820 = vmatprep.subr.mxu0 %v196_v14  ;;  %v514_v9 = vld [vmem:[%s5094_s4 + $0x50] sm:$0xff] }
  0x1f   :  { %2821 = vmatpush3.msra.mxu0 %v196_v14  ;;  %v511_v14 = vld [vmem:[%s5094_s4 + $0x38] sm:$0xff] }
  0x20   :  { %2822 = vmatprep.subr.mxu0 %v195_v15 }
  0x21   :  { %155 = vrot.lane.b32.xlu1 %v140_v16, %s2967_s25  ;;  %2823 = vmatpush3.msra.mxu0 %v195_v15  ;;  %v510_v15 = vld [vmem:[%s5094_s4 + $0x30] sm:$0xff]  ;;  %v509_v16 = vld [vmem:[%s5094_s4 + $0x28] sm:$0xff] }
  0x22   :  { %153 = vrot.lane.b32.xlu0 %v137_v17, %s2967_s25  ;;  %2824 = vmatprep.subr.mxu0 %v194_v18  ;;  %v508_v17 = vld [vmem:[%s5094_s4 + $0x20] sm:$0xff] }
  0x23   :  { %2825 = vmatpush3.msra.mxu0 %v194_v18  ;;  %v507_v18 = vld [vmem:[%s5094_s4 + $0x18] sm:$0xff] }
  0x24   :  { %2826 = vmatprep.subr.mxu0 %v193_v19 }
  0x25   :  { %2827 = vmatpush3.msra.mxu0 %v193_v19  ;;  %v2735_v19 = vld [vmem:[%s5096_s6] ss:$0 sm:$0xff] }
  0x26   :  { %2828 = vmatprep.subr.mxu0 %v192_v21 }
  0x27   :  { %2829 = vmatpush3.msra.mxu0 %v192_v21 }
  0x28   :  { %2877 = vmatprep.subr.mxu0 %v2968_v50 }
  0x77   :  { %v97_v22 = vpop.permute.xlu1 %96 }
  0x78   :  { %v93_v23 = vpop.permute.xlu0 %92 }
  0x79   :  { %v166_v34 = vsel %vm165_vm2, %v3032_v2, %v93_v23  ;;  %v333_v23 = vld [vmem:[%s5095_s5] sm:$0xff] }
  0x7b   :  { %v99_v24 = vpop.permute.xlu1 %98 }
  0x7c   :  { %v95_v25 = vpop.permute.xlu0 %94  ;;  %v169_v38 = vsel %vm165_vm2, %v3045_v7, %v99_v24 }
  0x7d   :  { %v167_v32 = vsel %vm165_vm2, %v3057_v11, %v95_v25  ;;  %v168_v11 = vsel %vm165_vm2, %v3022_v0, %v97_v22 }
  0x7f   :  { %v103_v26 = vpop.permute.xlu1 %102 }
  0x80   :  { %v101_v27 = vpop.permute.xlu0 %100  ;;  %v171_v42 = vsel %vm165_vm2, %v3062_v12, %v103_v26 }
  0x81   :  { %v170_v7 = vsel %vm165_vm2, %v3080_v20, %v101_v27 }
  0x83   :  { %v107_v29 = vpop.permute.xlu1 %106 }
  0x84   :  { %v105_v30 = vpop.permute.xlu0 %104  ;;  %v173_v46 = vsel %vm165_vm2, %v3097_v28, %v107_v29  ;;  %v405_v28 = vld [vmem:[%s5093_s3 + $0x78] sm:$0xff] }
  0x85   :  { %v172_v12 = vsel %vm165_vm2, %v3110_v31, %v105_v30  ;;  %2843 = vmatpush3.msra.mxu1 %v405_v28  ;;  %v404_v31 = vld [vmem:[%s5093_s3 + $0x70] sm:$0xff] }
  0x86   :  { %2844 = vmatprep.subr.mxu1 %v2968_v50 }
  0x87   :  { %v144_v33 = vpop.permute.xlu1 %143  ;;  %2845 = vmatpush3.msra.mxu1 %v404_v31 }
  0x88   :  { %v176_v35 = vsel %vm174_vm3, %v167_v32, %v144_v33  ;;  %v142_v36 = vpop.permute.xlu0 %141  ;;  %2846 = vmatprep.subr.mxu1 %v2968_v50 }
  0x89   :  { %v175_v37 = vsel %vm174_vm3, %v166_v34, %v142_v36  ;;  %2847 = vmatpush3.msra.mxu1 %v403_v51 }
  0x8a   :  { %2830 = vmatprep.mubr.msk.f32.mxu0 %vm183_vm4, %v175_v37  ;;  %2848 = vmatprep.subr.mxu1 %v2968_v50 }
  0x8b   :  { %2831 = vmatmul.mubr.msk.f32.vlgmr.msra.gmra.mxu0 %vm183_vm4, %v176_v35  ;;  %v148_v39 = vpop.permute.xlu1 %147  ;;  %2849 = vmatpush3.msra.mxu1 %v402_v52 }
  0x8c   :  { %v178_v40 = vsel %vm174_vm3, %v169_v38, %v148_v39  ;;  %v146_v41 = vpop.permute.xlu0 %145  ;;  %2850 = vmatprep.subr.mxu1 %v2968_v50  ;;  %2878 = vmatpush3.msra.mxu0 %v519_v3 }
  0x8d   :  { %v177_v2 = vsel %vm174_vm3, %v168_v11, %v146_v41  ;;  %2851 = vmatpush3.msra.mxu1 %v401_v53  ;;  %2879 = vmatprep.subr.mxu0 %v2968_v50 }
  0x8e   :  { %2833 = vmatprep.mubr.msk.f32.mxu0 %vm183_vm4, %v177_v2  ;;  %2852 = vmatprep.subr.mxu1 %v2968_v50 }
  0x8f   :  { %2834 = vmatmul.mubr.msk.f32.gmra.mxu0 %vm183_vm4, %v178_v40  ;;  %v152_v43 = vpop.permute.xlu1 %151  ;;  %2853 = vmatpush3.msra.mxu1 %v400_v54 }
  0x90   :  { %v180_v44 = vsel %vm174_vm3, %v171_v42, %v152_v43  ;;  %v150_v45 = vpop.permute.xlu0 %149  ;;  %2854 = vmatprep.subr.mxu1 %v2968_v50  ;;  %2880 = vmatpush3.msra.mxu0 %v518_v4 }
  0x91   :  { %v179_v0 = vsel %vm174_vm3, %v170_v7, %v150_v45  ;;  %2855 = vmatpush3.msra.mxu1 %v399_v55  ;;  %2881 = vmatprep.subr.mxu0 %v2968_v50 }
  0x92   :  { %2836 = vmatprep.mubr.msk.f32.mxu0 %vm183_vm4, %v179_v0  ;;  %2856 = vmatprep.subr.mxu1 %v2968_v50 }
  0x93   :  { %2837 = vmatmul.mubr.msk.f32.gmra.mxu0 %vm183_vm4, %v180_v44  ;;  %v156_v47 = vpop.permute.xlu1 %155  ;;  %2857 = vmatpush3.msra.mxu1 %v398_v56 }
  0x94   :  { %v182_v48 = vsel %vm174_vm3, %v173_v46, %v156_v47  ;;  %v154_v49 = vpop.permute.xlu0 %153  ;;  %2858 = vmatprep.subr.mxu1 %v2968_v50  ;;  %2882 = vmatpush3.msra.mxu0 %v517_v5 }
  0x95   :  { %v181_v20 = vsel %vm174_vm3, %v172_v12, %v154_v49  ;;  %2859 = vmatpush3.msra.mxu1 %v397_v57  ;;  %2883 = vmatprep.subr.mxu0 %v2968_v50  ;;  %vm2061_vm3 = vcmask 523712  }
  0x96   :  { %2839 = vmatprep.mubr.msk.f32.mxu0 %vm183_vm4, %v181_v20  ;;  %2860 = vmatprep.subr.mxu1 %v2968_v50 }
  0x97   :  { %2840 = vmatmul.mubr.msk.f32.gmra.mxu0 %vm183_vm4, %v182_v48  ;;  %2861 = vmatpush3.msra.mxu1 %v396_v58  ;;  %vm2068_vm4 = vcmask 589312  }
  0x98   :  { %2862 = vmatprep.subr.mxu1 %v2968_v50  ;;  %2909 = vmatprep.mubr.msk.f32.mxu0 %vm2969_vm5, %v2968_v50  ;;  %vm2075_vm5 = vcmask 654912  }
  0x99   :  { %2863 = vmatpush3.msra.mxu1 %v395_v59  ;;  %2884 = vmatpush3.msra.mxu0 %v516_v6 }
  0x9a   :  { %2864 = vmatprep.subr.mxu1 %v2968_v50  ;;  %2885 = vmatprep.subr.mxu0 %v2968_v50 }
  0x9b   :  { %2865 = vmatpush3.msra.mxu1 %v394_v60  ;;  %2886 = vmatpush3.msra.mxu0 %v515_v8 }
  0x9c   :  { %2866 = vmatprep.subr.mxu1 %v2968_v50  ;;  %2887 = vmatprep.subr.mxu0 %v2968_v50 }
  0x9d   :  { %2867 = vmatpush3.msra.mxu1 %v393_v61  ;;  %2888 = vmatpush3.msra.mxu0 %v514_v9 }
  0x9e   :  { %2868 = vmatprep.subr.mxu1 %v2968_v50  ;;  %2889 = vmatprep.subr.mxu0 %v2968_v50 }
  0x9f   :  { %2869 = vmatpush3.msra.mxu1 %v392_v62  ;;  %2890 = vmatpush3.msra.mxu0 %v513_v10 }
  0xa0   :  { %2870 = vmatprep.subr.mxu1 %v2968_v50  ;;  %2891 = vmatprep.subr.mxu0 %v2968_v50 }
  0xa1   :  { %2871 = vmatpush3.msra.mxu1 %v391_v63  ;;  %2892 = vmatpush3.msra.mxu0 %v512_v13 }
  0xa2   :  { %2872 = vmatprep.subr.mxu1 %v2968_v50  ;;  %2893 = vmatprep.subr.mxu0 %v2968_v50 }
  0xa3   :  { %2873 = vmatpush3.msra.mxu1 %v390_v1  ;;  %2894 = vmatpush3.msra.mxu0 %v511_v14 }
  0xa4   :  { %2895 = vmatprep.subr.mxu0 %v2968_v50 }
  0xa5   :  { %2896 = vmatpush3.msra.mxu0 %v510_v15 }
  0xa6   :  { %2897 = vmatprep.subr.mxu0 %v2968_v50 }
  0xa7   :  { %2898 = vmatpush3.msra.mxu0 %v509_v16 }
  0xa8   :  { %2899 = vmatprep.subr.mxu0 %v2968_v50 }
  0xa9   :  { %2900 = vmatpush3.msra.mxu0 %v508_v17 }
  0xaa   :  { %2901 = vmatprep.subr.mxu0 %v2968_v50 }
  0xab   :  { %2902 = vmatpush3.msra.mxu0 %v507_v18 }
  0xac   :  { %2903 = vmatprep.subr.mxu0 %v2968_v50 }
 0x14b   :  { %v2832_v21 = vpop.f32.mrf.mxu0 }
 0x14c   :  { %v318_v22 = vadd.f32 %v2832_v21, %v2735_v19 }
 0x14d   :  { %v274_v24 = vpop.f32.mrf.mxu0 }
 0x14e   :  { %v326_v25 = vmax.f32 %v318_v22, 0.0  ;;  %v317_v26 = vadd.f32 %v2735_v19, %v274_v24 }
 0x14f   :  { %v2835_v27 = vpop.f32.mrf.mxu0 }
 0x150   :  { %v335_v29 = vmul.f32 %v333_v23, %v326_v25  ;;  %v325_v30 = vmax.f32 %v317_v26, 0.0  ;;  %v320_v32 = vadd.f32 %v2835_v27, %v2735_v19 }
 0x151   :  { %v284_v33 = vpop.f32.mrf.mxu0 }
 0x152   :  { %v348_v34 = vrot.slane %v335_v29, 4  ;;  %v334_v35 = vmul.f32 %v333_v23, %v325_v30  ;;  %v328_v36 = vmax.f32 %v320_v32, 0.0  ;;  %v319_v37 = vadd.f32 %v2735_v19, %v284_v33 }
 0x153   :  { %v2838_v38 = vpop.f32.mrf.mxu0 }
 0x154   :  { %v349_v39 = vmax.f32 %v335_v29, %v348_v34  ;;  %v342_v11 = vrot.slane %v334_v35, 4  ;;  %v337_v40 = vmul.f32 %v333_v23, %v328_v36  ;;  %v327_v41 = vmax.f32 %v319_v37, 0.0 }
 0x155   :  { %v322_v2 = vadd.f32 %v2838_v38, %v2735_v19  ;;  %v294_v42 = vpop.f32.mrf.mxu0 }
 0x156   :  { %v350_v43 = vrot.slane %v349_v39, 2  ;;  %v343_v7 = vmax.f32 %v334_v35, %v342_v11  ;;  %v360_v44 = vrot.slane %v337_v40, 4  ;;  %v336_v45 = vmul.f32 %v333_v23, %v327_v41 }
 0x157   :  { %v330_v0 = vmax.f32 %v322_v2, 0.0  ;;  %v321_v46 = vadd.f32 %v2735_v19, %v294_v42  ;;  %v2841_v47 = vpop.f32.mrf.mxu0 }
 0x158   :  { %v344_v12 = vrot.slane %v343_v7, 2  ;;  %v361_v48 = vmax.f32 %v337_v40, %v360_v44  ;;  %v354_v49 = vrot.slane %v336_v45, 4  ;;  %v324_v31 = vadd.f32 %v2841_v47, %v2735_v19  ;;  %v2736_v47 = vld [vmem:[%s5096_s6 + $0x1] ss:$0 sm:$0xff] }
 0x159   :  { %v339_v20 = vmul.f32 %v333_v23, %v330_v0  ;;  %v329_v28 = vmax.f32 %v321_v46, 0.0  ;;  %v304_v51 = vpop.f32.mrf.mxu0  ;;  %v351_v52 = vmax.f32 %v349_v39, %v350_v43  ;;  %v505_v0 = vld [vmem:[%s5094_s4 + $0x8] sm:$0xff]  ;;  %v504_v46 = vld [vmem:[%s5094_s4] sm:$0xff] }
 0x15a   :  { %v345_v53 = vmax.f32 %v343_v7, %v344_v12  ;;  %v362_v54 = vrot.slane %v361_v48, 2  ;;  %v355_v55 = vmax.f32 %v336_v45, %v354_v49  ;;  %v332_v58 = vmax.f32 %v324_v31, 0.0  ;;  %v506_v45 = vld [vmem:[%s5094_s4 + $0x10] sm:$0xff] }
 0x15b   :  { %v372_v56 = vrot.slane %v339_v20, 4  ;;  %v338_v57 = vmul.f32 %v333_v23, %v329_v28  ;;  %v323_v59 = vadd.f32 %v2735_v19, %v304_v51  ;;  %v352_v4 = vrot.slane %v351_v52, 1  ;;  %2904 = vmatpush3.msra.mxu0 %v506_v45 }
 0x15c   :  { %v346_v60 = vrot.slane %v345_v53, 1  ;;  %v356_v61 = vrot.slane %v355_v55, 2  ;;  %v341_v1 = vmul.f32 %v333_v23, %v332_v58  ;;  %v363_v5 = vmax.f32 %v361_v48, %v362_v54  ;;  %2905 = vmatprep.subr.mxu0 %v2968_v50 }
 0x15d   :  { %v373_v62 = vmax.f32 %v339_v20, %v372_v56  ;;  %v366_v63 = vrot.slane %v338_v57, 4  ;;  %v331_v3 = vmax.f32 %v323_v59, 0.0  ;;  %v353_v19 = vmax.f32 %v351_v52, %v352_v4  ;;  %2906 = vmatpush3.msra.mxu0 %v505_v0  ;;  %v2738_v20 = vld [vmem:[%s5096_s6 + $0x3] ss:$0 sm:$0xff] }
 0x15e   :  { %v357_v6 = vmax.f32 %v355_v55, %v356_v61  ;;  %v384_v10 = vrot.slane %v341_v1, 4  ;;  %v347_v14 = vmax.f32 %v345_v53, %v346_v60  ;;  %v364_v21 = vrot.slane %v363_v5, 1  ;;  %2907 = vmatprep.subr.mxu0 %v2968_v50  ;;  %v2737_v50 = vld [vmem:[%s5096_s6 + $0x2] ss:$0 sm:$0xff] }
 0x15f   :  { %v374_v8 = vrot.slane %v373_v62, 2  ;;  %v367_v9 = vmax.f32 %v338_v57, %v366_v63  ;;  %v340_v13 = vmul.f32 %v333_v23, %v331_v3  ;;  %2908 = vmatpush3.msra.mxu0 %v504_v46  ;;  %v2970_v52 = vmov 1966171168  }
 0x160   :  { %v358_v15 = vrot.slane %v357_v6, 1  ;;  %v385_v17 = vmax.f32 %v341_v1, %v384_v10  ;;  %v419_v29 = vsel %vm418_vm6, %v353_v19, %v347_v14  ;;  %v365_v34 = vmax.f32 %v363_v5, %v364_v21 }
 0x161   :  { %v368_v16 = vrot.slane %v367_v9, 2  ;;  %v378_v18 = vrot.slane %v340_v13, 4  ;;  %v375_v24 = vmax.f32 %v373_v62, %v374_v8  ;;  %v728_v53 = vunpack.c.l.s4 %v2970_v52  ;;  %v598_v8 = vld [vmem:[%s5091_s1 + $0x8] sm:$0xff] }
 0x162   :  { %v359_v22 = vmax.f32 %v357_v6, %v358_v15  ;;  %v386_v26 = vrot.slane %v385_v17, 2  ;;  %v5099_v54 = vlaneseq }
 0x163   :  { %v369_v25 = vmax.f32 %v367_v9, %v368_v16  ;;  %v379_v27 = vmax.f32 %v340_v13, %v378_v18  ;;  %v376_v35 = vrot.slane %v375_v24, 1  ;;  %v729_v55 = vunpack.c.0.s8 %v728_v53  ;;  %v597_v9 = vld [vmem:[%s5091_s1] sm:$0xff]  ;;  %v599_v16 = vld [vmem:[%s5091_s1 + $0x10] sm:$0xff] }
 0x164   :  { %v387_v32 = vmax.f32 %v385_v17, %v386_v26  ;;  %v421_v33 = vsel %vm420_vm7, %v359_v22, %v419_v29  ;;  %v3392_v56 = vshrl.u32 %v5099_v54, 7  ;;  %v600_v17 = vld [vmem:[%s5091_s1 + $0x18] sm:$0xff] }
 0x165   :  { %v370_v30 = vrot.slane %v369_v25, 1  ;;  %v380_v23 = vrot.slane %v379_v27, 2  ;;  %v423_v39 = vsel %vm5104_vm8, %v365_v34, %v421_v33  ;;  %v377_v41 = vmax.f32 %v375_v24, %v376_v35  ;;  %v601_v33 = vld [vmem:[%s5091_s1 + $0x20] sm:$0xff]  ;;  %v602_v34 = vld [vmem:[%s5091_s1 + $0x28] sm:$0xff] }
 0x166   :  { %v388_v38 = vrot.slane %v387_v32, 1  ;;  %v732_v57 = vsub.s32 %v729_v55, %v3392_v56  ;;  %v3398_v3 = vsub.s32 0, %v3392_v56  ;;  %vm2110_vm8 = vcmask 982912  }
 0x167   :  { %v371_v36 = vmax.f32 %v369_v25, %v370_v30  ;;  %v381_v37 = vmax.f32 %v379_v27, %v380_v23 }
 0x168   :  { %v389_v42 = vmax.f32 %v387_v32, %v388_v38 }
 0x169   :  { %v382_v11 = vrot.slane %v381_v37, 1  ;;  %v425_v40 = vsel %vm5103_vm9, %v371_v36, %v423_v39  ;;  %v603_v39 = vld [vmem:[%s5091_s1 + $0x30] sm:$0xff]  ;;  %vm2103_vm9 = vcmask 917312  }
 0x16a   :  { %v427_v43 = vsel %vm5102_vm10, %v377_v41, %v425_v40  ;;  %vm2096_vm10 = vcmask 851712  }
 0x16b   :  { %v383_v2 = vmax.f32 %v381_v37, %v382_v11  ;;  %v604_v11 = vld [vmem:[%s5091_s1 + $0x38] sm:$0xff] }
 0x16d   :  { %v429_v7 = vsel %vm5101_vm11, %v383_v2, %v427_v43  ;;  %v605_v43 = vld [vmem:[%s5091_s1 + $0x40] sm:$0xff]  ;;  %vm5105_vm11 = vcmask 786112  }
 0x16e   :  { %v431_v44 = vsel %vm5100_vm12, %v389_v42, %v429_v7  ;;  %v606_v7 = vld [vmem:[%s5091_s1 + $0x48] sm:$0xff]  ;;  %vm2082_vm12 = vcmask 720512  }
 0x16f   :  { %2875 = vmatmul.mubr.f32.vlgmr.msra.gmra.mxu1 %v431_v44 }
 0x22f   :  { %v499_v12 = vpop.f32.mrf.mxu1 }
 0x230   :  { %v500_v48 = vadd.f32 %v2736_v47, %v499_v12  ;;  %v607_v47 = vld [vmem:[%s5091_s1 + $0x50] sm:$0xff]  ;;  %v608_v12 = vld [vmem:[%s5091_s1 + $0x58] sm:$0xff] }
 0x231   :  { %v2876_v49 = vpop.f32.mrf.mxu1 }
 0x232   :  { %v503_v28 = vmax.f32 %v500_v48, 0.0 }
 0x234   :  { %2910 = vmatmul.mubr.f32.vlgmr.msra.gmra.mxu0 %v503_v28  ;;  %v2685_v31 = vmul.f32 %v2738_v20, %v503_v28  ;;  %v594_v51 = vmul.f32 %v2737_v50, %v503_v28  ;;  %v609_v28 = vld [vmem:[%s5091_s1 + $0x60] sm:$0xff] }
 0x236   :  { %2686 = vadd.xlane.f32.xlu1 %v2685_v31  ;;  %595 = vadd.xlane.f32.xlu0 %v594_v51  ;;  %v610_v31 = vld [vmem:[%s5091_s1 + $0x68] sm:$0xff] }
 0x2f4   :  { %v586_v58 = vpop.f32.mrf.mxu0 }
 0x2f5   :  { %v726_v59 = vcombine.high %v586_v58, %v586_v58  ;;  %v733_v60 = vrot.slane %v586_v58, %v732_v57  ;;  %v612_v58 = vld [vmem:[%s5091_s1 + $0x78] sm:$0xff] }
 0x2f6   :  { %v2911_v61 = vpop.f32.mrf.mxu0 }
 0x2f7   :  { %v740_v62 = vrot.slane %v726_v59, %v732_v57  ;;  %v741_v63 = vcombine.high %v733_v60, %v733_v60  ;;  %v3395_v1 = vrot.slane %v733_v60, %v732_v57 }
 0x2f9   :  { %v742_v4 = vcombine.high %v740_v62, %v740_v62  ;;  %v756_v5 = vrot.slane %v740_v62, %v732_v57  ;;  %v3400_v6 = vrot.slane %v741_v63, %v732_v57  ;;  %v3410_v10 = vrot.slane %v3395_v1, %v3398_v3 }
 0x2fb   :  { %v770_v13 = vrot.slane %v742_v4, %v732_v57  ;;  %v772_v14 = vcombine.high %v756_v5, %v756_v5  ;;  %v773_v15 = vcombine.high %v3400_v6, %v3400_v6  ;;  %v3421_v18 = vrot.slane %v756_v5, %v3398_v3  ;;  %v611_v57 = vld [vmem:[%s5091_s1 + $0x70] sm:$0xff]  ;;  %v614_v4 = vld [vmem:[%s5091_s1 + $0x88] sm:$0xff]  ;;  %v613_v5 = vld [vmem:[%s5091_s1 + $0x80] sm:$0xff] }
 0x2fc   :  { %v816_v19 = vmul.f32 %v3410_v10, %v598_v8  ;;  %v815_v21 = vmul.f32 %v3410_v10, %v597_v9  ;;  %v817_v30 = vmul.f32 %v3410_v10, %v599_v16  ;;  %v818_v32 = vmul.f32 %v3410_v10, %v600_v17 }
 0x2fd   :  { %v774_v22 = vcombine.high %v770_v13, %v770_v13  ;;  %v3426_v24 = vrot.slane %v773_v15, %v3398_v3  ;;  %v3429_v25 = vrot.slane %v770_v13, %v3398_v3  ;;  %v3432_v26 = vrot.slane %v772_v14, %v3398_v3  ;;  %v615_v14 = vld [vmem:[%s5091_s1 + $0x90] sm:$0xff] }
 0x2fe   :  { %v946_v27 = vsel %vm165_vm2, %v816_v19, 0.0  ;;  %v943_v29 = vsel %vm165_vm2, %v815_v21, 0.0  ;;  %v949_v35 = vsel %vm165_vm2, %v817_v30, 0.0  ;;  %v952_v36 = vsel %vm165_vm2, %v818_v32, 0.0  ;;  %v618_v21 = vld [vmem:[%s5091_s1 + $0xa8] sm:$0xff] }
 0x2ff   :  { %v3439_v23 = vrot.slane %v774_v22, %v3398_v3  ;;  %947 = vadd.xlane.f32.xlu0 %v946_v27  ;;  %944 = vadd.xlane.f32.xlu1 %v943_v29  ;;  %v819_v37 = vmul.f32 %v3410_v10, %v601_v33  ;;  %v820_v38 = vmul.f32 %v3410_v10, %v602_v34  ;;  %v617_v22 = vld [vmem:[%s5091_s1 + $0xa0] sm:$0xff]  ;;  %v620_v33 = vld [vmem:[%s5091_s1 + $0xb8] sm:$0xff]  ;;  %v619_v34 = vld [vmem:[%s5091_s1 + $0xb0] sm:$0xff] }
 0x300   :  { %v821_v2 = vmul.f32 %v3410_v10, %v603_v39  ;;  %v822_v42 = vmul.f32 %v3410_v10, %v604_v11  ;;  %v823_v0 = vmul.f32 %v3410_v10, %v605_v43  ;;  %v824_v46 = vmul.f32 %v3410_v10, %v606_v7  ;;  %v622_v39 = vld [vmem:[%s5091_s1 + $0xc8] sm:$0xff]  ;;  %v621_v11 = vld [vmem:[%s5091_s1 + $0xc0] sm:$0xff]  ;;  %v624_v43 = vld [vmem:[%s5091_s1 + $0xd8] sm:$0xff] }
 0x301   :  { %v955_v40 = vsel %vm165_vm2, %v819_v37, 0.0  ;;  %v958_v41 = vsel %vm165_vm2, %v820_v38, 0.0  ;;  %v825_v20 = vmul.f32 %v3410_v10, %v607_v47  ;;  %v826_v50 = vmul.f32 %v3410_v10, %v608_v12  ;;  %v623_v7 = vld [vmem:[%s5091_s1 + $0xd0] sm:$0xff]  ;;  %v626_v47 = vld [vmem:[%s5091_s1 + $0xe8] sm:$0xff]  ;;  %v625_v12 = vld [vmem:[%s5091_s1 + $0xe0] sm:$0xff] }
 0x302   :  { %v961_v44 = vsel %vm165_vm2, %v821_v2, 0.0  ;;  %v964_v45 = vsel %vm165_vm2, %v822_v42, 0.0  ;;  %v967_v48 = vsel %vm165_vm2, %v823_v0, 0.0  ;;  %v970_v49 = vsel %vm165_vm2, %v824_v46, 0.0 }
 0x303   :  { %950 = vadd.xlane.f32.xlu0 %v949_v35  ;;  %953 = vadd.xlane.f32.xlu1 %v952_v36  ;;  %v973_v51 = vsel %vm165_vm2, %v825_v20, 0.0  ;;  %v976_v52 = vsel %vm165_vm2, %v826_v50, 0.0  ;;  %v827_v53 = vmul.f32 %v3410_v10, %v609_v28  ;;  %v828_v55 = vmul.f32 %v3410_v10, %v610_v31  ;;  %v628_v31 = vld [vmem:[%s5091_s1 + $0xf8] sm:$0xff] }
 0x304   :  { %v3499_v59 = vrot.slane %v3400_v6, %v3398_v3  ;;  %v829_v62 = vmul.f32 %v3410_v10, %v611_v57  ;;  %v830_v63 = vmul.f32 %v3410_v10, %v612_v58  ;;  %v616_v10 = vld [vmem:[%s5091_s1 + $0x98] sm:$0xff]  ;;  %v630_v58 = vld [vmem:[%s5091_s1 + $0x108] sm:$0xff] }
 0x305   :  { %v979_v60 = vsel %vm165_vm2, %v827_v53, 0.0  ;;  %v982_v61 = vsel %vm165_vm2, %v828_v55, 0.0 }
 0x306   :  { %v985_v6 = vsel %vm165_vm2, %v829_v62, 0.0  ;;  %v988_v8 = vsel %vm165_vm2, %v830_v63, 0.0  ;;  %v832_v9 = vmul.f32 %v3499_v59, %v614_v4  ;;  %v831_v13 = vmul.f32 %v3499_v59, %v613_v5  ;;  %v631_v5 = vld [vmem:[%s5091_s1 + $0x110] sm:$0xff] }
 0x307   :  { %956 = vadd.xlane.f32.xlu0 %v955_v40  ;;  %959 = vadd.xlane.f32.xlu1 %v958_v41  ;;  %v834_v17 = vmul.f32 %v3499_v59, %v616_v10  ;;  %v833_v19 = vmul.f32 %v3499_v59, %v615_v14  ;;  %v836_v30 = vmul.f32 %v3499_v59, %v618_v21  ;;  %v634_v10 = vld [vmem:[%s5091_s1 + $0x128] sm:$0xff]  ;;  %v633_v14 = vld [vmem:[%s5091_s1 + $0x120] sm:$0xff]  ;;  %v636_v21 = vld [vmem:[%s5091_s1 + $0x138] sm:$0xff] }
 0x308   :  { %v994_v15 = vsel %vm165_vm2, %v832_v9, 0.0  ;;  %v991_v16 = vsel %vm165_vm2, %v831_v13, 0.0  ;;  %v835_v32 = vmul.f32 %v3499_v59, %v617_v22  ;;  %v838_v37 = vmul.f32 %v3499_v59, %v620_v33  ;;  %v635_v22 = vld [vmem:[%s5091_s1 + $0x130] sm:$0xff]  ;;  %v638_v33 = vld [vmem:[%s5091_s1 + $0x148] sm:$0xff] }
 0x309   :  { %v1000_v27 = vsel %vm165_vm2, %v834_v17, 0.0  ;;  %v997_v29 = vsel %vm165_vm2, %v833_v19, 0.0  ;;  %v1006_v35 = vsel %vm165_vm2, %v836_v30, 0.0  ;;  %v837_v38 = vmul.f32 %v3499_v59, %v619_v34  ;;  %v637_v34 = vld [vmem:[%s5091_s1 + $0x140] sm:$0xff] }
 0x30a   :  { %v1003_v36 = vsel %vm165_vm2, %v835_v32, 0.0  ;;  %v1012_v40 = vsel %vm165_vm2, %v838_v37, 0.0  ;;  %v840_v2 = vmul.f32 %v3499_v59, %v622_v39  ;;  %v839_v42 = vmul.f32 %v3499_v59, %v621_v11  ;;  %v640_v39 = vld [vmem:[%s5091_s1 + $0x158] sm:$0xff]  ;;  %v639_v11 = vld [vmem:[%s5091_s1 + $0x150] sm:$0xff] }
 0x30b   :  { %962 = vadd.xlane.f32.xlu0 %v961_v44  ;;  %965 = vadd.xlane.f32.xlu1 %v964_v45  ;;  %v1009_v41 = vsel %vm165_vm2, %v837_v38, 0.0  ;;  %v842_v0 = vmul.f32 %v3499_v59, %v624_v43  ;;  %v841_v46 = vmul.f32 %v3499_v59, %v623_v7  ;;  %v844_v50 = vmul.f32 %v3499_v59, %v626_v47  ;;  %v642_v43 = vld [vmem:[%s5091_s1 + $0x168] sm:$0xff]  ;;  %v641_v7 = vld [vmem:[%s5091_s1 + $0x160] sm:$0xff]  ;;  %v644_v47 = vld [vmem:[%s5091_s1 + $0x178] sm:$0xff] }
 0x30c   :  { %v1018_v44 = vsel %vm165_vm2, %v840_v2, 0.0  ;;  %v1015_v45 = vsel %vm165_vm2, %v839_v42, 0.0  ;;  %v843_v28 = vmul.f32 %v3499_v59, %v625_v12  ;;  %v846_v55 = vmul.f32 %v3499_v59, %v628_v31  ;;  %v643_v12 = vld [vmem:[%s5091_s1 + $0x170] sm:$0xff]  ;;  %v661_v31 = vld [vmem:[%s5091_s1 + $0x200] sm:$0xff] }
 0x30d   :  { %v1021_v20 = vsel %vm165_vm2, %v841_v46, 0.0 }
 0x30e   :  { %v1027_v53 = vsel %vm165_vm2, %v843_v28, 0.0  ;;  %v662_v28 = vld [vmem:[%s5091_s1 + $0x208] sm:$0xff] }
 0x30f   :  { %968 = vadd.xlane.f32.xlu0 %v967_v48  ;;  %971 = vadd.xlane.f32.xlu1 %v970_v49  ;;  %v771_v48 = vcombine.high %v3395_v1, %v3395_v1  ;;  %v1024_v49 = vsel %vm165_vm2, %v842_v0, 0.0 }
 0x311   :  { %v3584_v1 = vrot.slane %v771_v48, %v3398_v3 }
 0x313   :  { %974 = vadd.xlane.f32.xlu0 %v973_v51  ;;  %977 = vadd.xlane.f32.xlu1 %v976_v52  ;;  %v627_v51 = vld [vmem:[%s5091_s1 + $0xf0] sm:$0xff]  ;;  %v1030_v52 = vsel %vm165_vm2, %v844_v50, 0.0  ;;  %v848_v63 = vmul.f32 %v3584_v1, %v630_v58  ;;  %v849_v13 = vmul.f32 %v3584_v1, %v631_v5  ;;  %v852_v17 = vmul.f32 %v3584_v1, %v634_v10 }
 0x314   :  { %v845_v57 = vmul.f32 %v3499_v59, %v627_v51  ;;  %v632_v59 = vld [vmem:[%s5091_s1 + $0x118] sm:$0xff]  ;;  %v851_v19 = vmul.f32 %v3584_v1, %v633_v14  ;;  %v854_v30 = vmul.f32 %v3584_v1, %v636_v21  ;;  %v853_v32 = vmul.f32 %v3584_v1, %v635_v22 }
 0x315   :  { %v850_v9 = vmul.f32 %v3584_v1, %v632_v59  ;;  %v856_v37 = vmul.f32 %v3584_v1, %v638_v33  ;;  %v855_v38 = vmul.f32 %v3584_v1, %v637_v34  ;;  %v858_v2 = vmul.f32 %v3584_v1, %v640_v39 }
 0x316   :  { %v1033_v62 = vsel %vm165_vm2, %v845_v57, 0.0  ;;  %v857_v42 = vmul.f32 %v3584_v1, %v639_v11  ;;  %v860_v0 = vmul.f32 %v3584_v1, %v642_v43  ;;  %v859_v46 = vmul.f32 %v3584_v1, %v641_v7  ;;  %v663_v57 = vld [vmem:[%s5091_s1 + $0x210] sm:$0xff] }
 0x317   :  { %980 = vadd.xlane.f32.xlu0 %v979_v60  ;;  %983 = vadd.xlane.f32.xlu1 %v982_v61  ;;  %v629_v60 = vld [vmem:[%s5091_s1 + $0x100] sm:$0xff]  ;;  %v1036_v61 = vsel %vm165_vm2, %v846_v55, 0.0  ;;  %v861_v50 = vmul.f32 %v3584_v1, %v643_v12  ;;  %v879_v55 = vmul.f32 %v3421_v18, %v661_v31 }
 0x318   :  { %v847_v4 = vmul.f32 %v3584_v1, %v629_v60  ;;  %v1078_v48 = vsel %vm165_vm2, %v860_v0, 0.0  ;;  %v646_v0 = vld [vmem:[%s5091_s1 + $0x188] sm:$0xff] }
 0x319   :  { %v1135_v60 = vsel %vm165_vm2, %v879_v55, 0.0 }
 0x31b   :  { %986 = vadd.xlane.f32.xlu0 %v985_v6  ;;  %989 = vadd.xlane.f32.xlu1 %v988_v8  ;;  %v1042_v6 = vsel %vm165_vm2, %v848_v63, 0.0  ;;  %v1039_v8 = vsel %vm165_vm2, %v847_v4, 0.0  ;;  %v666_v63 = vld [vmem:[%s5091_s1 + $0x228] sm:$0xff]  ;;  %v665_v4 = vld [vmem:[%s5091_s1 + $0x220] sm:$0xff] }
 0x31f   :  { %995 = vadd.xlane.f32.xlu1 %v994_v15  ;;  %992 = vadd.xlane.f32.xlu0 %v991_v16  ;;  %v1048_v15 = vsel %vm165_vm2, %v850_v9, 0.0  ;;  %v1045_v16 = vsel %vm165_vm2, %v849_v13, 0.0  ;;  %v668_v9 = vld [vmem:[%s5091_s1 + $0x238] sm:$0xff]  ;;  %v667_v13 = vld [vmem:[%s5091_s1 + $0x230] sm:$0xff] }
 0x323   :  { %1001 = vadd.xlane.f32.xlu1 %v1000_v27  ;;  %998 = vadd.xlane.f32.xlu0 %v997_v29  ;;  %v1054_v27 = vsel %vm165_vm2, %v852_v17, 0.0  ;;  %v1051_v29 = vsel %vm165_vm2, %v851_v19, 0.0  ;;  %v670_v17 = vld [vmem:[%s5091_s1 + $0x248] sm:$0xff]  ;;  %v669_v19 = vld [vmem:[%s5091_s1 + $0x240] sm:$0xff] }
 0x327   :  { %1007 = vadd.xlane.f32.xlu1 %v1006_v35  ;;  %1004 = vadd.xlane.f32.xlu0 %v1003_v36  ;;  %v1060_v35 = vsel %vm165_vm2, %v854_v30, 0.0  ;;  %v1057_v36 = vsel %vm165_vm2, %v853_v32, 0.0  ;;  %v672_v30 = vld [vmem:[%s5091_s1 + $0x258] sm:$0xff]  ;;  %v671_v32 = vld [vmem:[%s5091_s1 + $0x250] sm:$0xff] }
 0x32b   :  { %1013 = vadd.xlane.f32.xlu1 %v1012_v40  ;;  %1010 = vadd.xlane.f32.xlu0 %v1009_v41  ;;  %v1066_v40 = vsel %vm165_vm2, %v856_v37, 0.0  ;;  %v1063_v41 = vsel %vm165_vm2, %v855_v38, 0.0  ;;  %v674_v37 = vld [vmem:[%s5091_s1 + $0x268] sm:$0xff]  ;;  %v673_v38 = vld [vmem:[%s5091_s1 + $0x260] sm:$0xff] }
 0x32f   :  { %1019 = vadd.xlane.f32.xlu1 %v1018_v44  ;;  %1016 = vadd.xlane.f32.xlu0 %v1015_v45  ;;  %v1072_v44 = vsel %vm165_vm2, %v858_v2, 0.0  ;;  %v1069_v45 = vsel %vm165_vm2, %v857_v42, 0.0  ;;  %v676_v2 = vld [vmem:[%s5091_s1 + $0x278] sm:$0xff]  ;;  %v675_v42 = vld [vmem:[%s5091_s1 + $0x270] sm:$0xff] }
 0x333   :  { %1025 = vadd.xlane.f32.xlu1 %v1024_v49  ;;  %1022 = vadd.xlane.f32.xlu0 %v1021_v20  ;;  %v1075_v49 = vsel %vm165_vm2, %v859_v46, 0.0  ;;  %v862_v20 = vmul.f32 %v3584_v1, %v644_v47  ;;  %v664_v1 = vld [vmem:[%s5091_s1 + $0x218] sm:$0xff]  ;;  %v645_v46 = vld [vmem:[%s5091_s1 + $0x180] sm:$0xff] }
 0x335   :  { %v1084_v51 = vsel %vm165_vm2, %v862_v20, 0.0  ;;  %v647_v20 = vld [vmem:[%s5091_s1 + $0x190] sm:$0xff] }
 0x337   :  { %1031 = vadd.xlane.f32.xlu1 %v1030_v52  ;;  %1028 = vadd.xlane.f32.xlu0 %v1027_v53  ;;  %v1081_v52 = vsel %vm165_vm2, %v861_v50, 0.0  ;;  %v880_v53 = vmul.f32 %v3421_v18, %v662_v28 }
 0x339   :  { %v1138_v58 = vsel %vm165_vm2, %v880_v53, 0.0  ;;  %v649_v53 = vld [vmem:[%s5091_s1 + $0x1a0] sm:$0xff] }
 0x33b   :  { %1037 = vadd.xlane.f32.xlu1 %v1036_v61  ;;  %1034 = vadd.xlane.f32.xlu0 %v1033_v62  ;;  %v882_v61 = vmul.f32 %v3421_v18, %v664_v1  ;;  %v881_v62 = vmul.f32 %v3421_v18, %v663_v57 }
 0x33d   :  { %v1144_v59 = vsel %vm165_vm2, %v882_v61, 0.0  ;;  %v1141_v5 = vsel %vm165_vm2, %v881_v62, 0.0  ;;  %v651_v61 = vld [vmem:[%s5091_s1 + $0x1b0] sm:$0xff]  ;;  %v3786_v62 = vpop.xlane.xlu1 %2686 }
 0x33e   :  { %5106 = vst [vmem:[#allocation8_spill] sm:$0xff] %v3786_v62 }
 0x33f   :  { %1043 = vadd.xlane.f32.xlu1 %v1042_v6  ;;  %1040 = vadd.xlane.f32.xlu0 %v1039_v8  ;;  %v884_v6 = vmul.f32 %v3421_v18, %v666_v63  ;;  %v883_v8 = vmul.f32 %v3421_v18, %v665_v4  ;;  %v3788_v63 = vpop.xlane.xlu0 %595 }
 0x341   :  { %v1150_v10 = vsel %vm165_vm2, %v884_v6, 0.0  ;;  %v1147_v14 = vsel %vm165_vm2, %v883_v8, 0.0  ;;  %v869_v6 = vmul.f32 %v3426_v24, %v651_v61  ;;  %v3796_v8 = vrot.slane %v3788_v63, %v3398_v3  ;;  %v680_v61 = vld [vmem:[%s5091_s1 + $0x298] sm:$0xff] }
 0x343   :  { %1049 = vadd.xlane.f32.xlu1 %v1048_v15  ;;  %1046 = vadd.xlane.f32.xlu0 %v1045_v16  ;;  %v886_v15 = vmul.f32 %v3421_v18, %v668_v9  ;;  %v885_v16 = vmul.f32 %v3421_v18, %v667_v13  ;;  %v654_v9 = vld [vmem:[%s5091_s1 + $0x1c8] sm:$0xff]  ;;  %v653_v13 = vld [vmem:[%s5091_s1 + $0x1c0] sm:$0xff] }
 0x345   :  { %v1156_v21 = vsel %vm165_vm2, %v886_v15, 0.0  ;;  %v1153_v22 = vsel %vm165_vm2, %v885_v16, 0.0 }
 0x347   :  { %1055 = vadd.xlane.f32.xlu1 %v1054_v27  ;;  %1052 = vadd.xlane.f32.xlu0 %v1051_v29  ;;  %v888_v27 = vmul.f32 %v3421_v18, %v670_v17  ;;  %v887_v29 = vmul.f32 %v3421_v18, %v669_v19  ;;  %v1105_v17 = vsel %vm165_vm2, %v869_v6, 0.0  ;;  %v872_v19 = vmul.f32 %v3426_v24, %v654_v9 }
 0x349   :  { %v1162_v33 = vsel %vm165_vm2, %v888_v27, 0.0  ;;  %v1159_v34 = vsel %vm165_vm2, %v887_v29, 0.0  ;;  %v656_v27 = vld [vmem:[%s5091_s1 + $0x1d8] sm:$0xff]  ;;  %v655_v29 = vld [vmem:[%s5091_s1 + $0x1d0] sm:$0xff] }
 0x34b   :  { %1061 = vadd.xlane.f32.xlu1 %v1060_v35  ;;  %1058 = vadd.xlane.f32.xlu0 %v1057_v36  ;;  %v890_v35 = vmul.f32 %v3421_v18, %v672_v30  ;;  %v889_v36 = vmul.f32 %v3421_v18, %v671_v32 }
 0x34d   :  { %v1168_v39 = vsel %vm165_vm2, %v890_v35, 0.0  ;;  %v1165_v11 = vsel %vm165_vm2, %v889_v36, 0.0  ;;  %v1114_v35 = vsel %vm165_vm2, %v872_v19, 0.0  ;;  %v681_v19 = vld [vmem:[%s5091_s1 + $0x2a0] sm:$0xff] }
 0x34f   :  { %1067 = vadd.xlane.f32.xlu1 %v1066_v40  ;;  %1064 = vadd.xlane.f32.xlu0 %v1063_v41  ;;  %v892_v40 = vmul.f32 %v3421_v18, %v674_v37  ;;  %v891_v41 = vmul.f32 %v3421_v18, %v673_v38  ;;  %v874_v37 = vmul.f32 %v3426_v24, %v656_v27 }
 0x350   :  { %v873_v38 = vmul.f32 %v3426_v24, %v655_v29 }
 0x351   :  { %v1174_v43 = vsel %vm165_vm2, %v892_v40, 0.0  ;;  %v1171_v7 = vsel %vm165_vm2, %v891_v41, 0.0 }
 0x353   :  { %1073 = vadd.xlane.f32.xlu1 %v1072_v44  ;;  %1070 = vadd.xlane.f32.xlu0 %v1069_v45  ;;  %v894_v44 = vmul.f32 %v3421_v18, %v676_v2  ;;  %v893_v45 = vmul.f32 %v3421_v18, %v675_v42  ;;  %v648_v18 = vld [vmem:[%s5091_s1 + $0x198] sm:$0xff] }
 0x354   :  { %v866_v31 = vmul.f32 %v3426_v24, %v648_v18 }
 0x355   :  { %v1180_v47 = vsel %vm165_vm2, %v894_v44, 0.0  ;;  %v1177_v12 = vsel %vm165_vm2, %v893_v45, 0.0 }
 0x356   :  { %v1096_v55 = vsel %vm165_vm2, %v866_v31, 0.0  ;;  %v678_v31 = vld [vmem:[%s5091_s1 + $0x288] sm:$0xff] }
 0x357   :  { %1079 = vadd.xlane.f32.xlu1 %v1078_v48  ;;  %1076 = vadd.xlane.f32.xlu0 %v1075_v49  ;;  %v864_v48 = vmul.f32 %v3426_v24, %v646_v0  ;;  %v863_v49 = vmul.f32 %v3426_v24, %v645_v46  ;;  %v660_v0 = vld [vmem:[%s5091_s1 + $0x1f8] sm:$0xff]  ;;  %v659_v46 = vld [vmem:[%s5091_s1 + $0x1f0] sm:$0xff] }
 0x359   :  { %v1090_v50 = vsel %vm165_vm2, %v864_v48, 0.0  ;;  %v1087_v28 = vsel %vm165_vm2, %v863_v49, 0.0 }
 0x35b   :  { %1085 = vadd.xlane.f32.xlu1 %v1084_v51  ;;  %1082 = vadd.xlane.f32.xlu0 %v1081_v52  ;;  %v865_v51 = vmul.f32 %v3426_v24, %v647_v20  ;;  %v650_v52 = vld [vmem:[%s5091_s1 + $0x1a8] sm:$0xff] }
 0x35c   :  { %v868_v57 = vmul.f32 %v3426_v24, %v650_v52 }
 0x35d   :  { %v1093_v1 = vsel %vm165_vm2, %v865_v51, 0.0  ;;  %v677_v51 = vld [vmem:[%s5091_s1 + $0x280] sm:$0xff] }
 0x35e   :  { %v1102_v4 = vsel %vm165_vm2, %v868_v57, 0.0 }
 0x35f   :  { %1139 = vadd.xlane.f32.xlu1 %v1138_v58  ;;  %1136 = vadd.xlane.f32.xlu0 %v1135_v60  ;;  %v867_v58 = vmul.f32 %v3426_v24, %v649_v53  ;;  %v652_v60 = vld [vmem:[%s5091_s1 + $0x1b8] sm:$0xff] }
 0x363   :  { %1145 = vadd.xlane.f32.xlu1 %v1144_v59  ;;  %1142 = vadd.xlane.f32.xlu0 %v1141_v5  ;;  %v1099_v59 = vsel %vm165_vm2, %v867_v58, 0.0  ;;  %v870_v5 = vmul.f32 %v3426_v24, %v652_v60  ;;  %v896_v58 = vmul.f32 %v3429_v25, %v678_v31  ;;  %v895_v60 = vmul.f32 %v3429_v25, %v677_v51  ;;  %v687_v31 = vld [vmem:[%s5091_s1 + $0x2d0] sm:$0xff] }
 0x365   :  { %v1108_v3 = vsel %vm165_vm2, %v870_v5, 0.0 }
 0x367   :  { %1151 = vadd.xlane.f32.xlu1 %v1150_v10  ;;  %1148 = vadd.xlane.f32.xlu0 %v1147_v14 }
 0x36b   :  { %1157 = vadd.xlane.f32.xlu1 %v1156_v21  ;;  %1154 = vadd.xlane.f32.xlu0 %v1153_v22  ;;  %v871_v21 = vmul.f32 %v3426_v24, %v653_v13  ;;  %v2971_v22 = vmov 0   ;;  %v1186_v13 = vsel %vm165_vm2, %v896_v58, 0.0  ;;  %v905_v58 = vmul.f32 %v3429_v25, %v687_v31  ;;  %v697_v31 = vld [vmem:[%s5091_s1 + $0x320] sm:$0xff] }
 0x36c   :  { %2921 = vset.pattern.permute.xlu1 %v2971_v22  ;;  %2920 = vset.pattern.permute.xlu0 %v2971_v22 }
 0x36d   :  { %v1111_v36 = vsel %vm165_vm2, %v871_v21, 0.0 }
 0x36f   :  { %1163 = vadd.xlane.f32.xlu1 %v1162_v33  ;;  %1160 = vadd.xlane.f32.xlu0 %v1159_v34 }
 0x373   :  { %1169 = vadd.xlane.f32.xlu1 %v1168_v39  ;;  %1166 = vadd.xlane.f32.xlu0 %v1165_v11  ;;  %v658_v39 = vld [vmem:[%s5091_s1 + $0x1e8] sm:$0xff]  ;;  %v657_v11 = vld [vmem:[%s5091_s1 + $0x1e0] sm:$0xff] }
 0x374   :  { %v876_v44 = vmul.f32 %v3426_v24, %v658_v39  ;;  %v875_v45 = vmul.f32 %v3426_v24, %v657_v11 }
 0x376   :  { %v1126_v18 = vsel %vm165_vm2, %v876_v44, 0.0  ;;  %v1123_v20 = vsel %vm165_vm2, %v875_v45, 0.0 }
 0x377   :  { %1175 = vadd.xlane.f32.xlu1 %v1174_v43  ;;  %1172 = vadd.xlane.f32.xlu0 %v1171_v7  ;;  %v1120_v43 = vsel %vm165_vm2, %v874_v37, 0.0  ;;  %v1117_v7 = vsel %vm165_vm2, %v873_v38, 0.0  ;;  %v684_v37 = vld [vmem:[%s5091_s1 + $0x2b8] sm:$0xff]  ;;  %v683_v38 = vld [vmem:[%s5091_s1 + $0x2b0] sm:$0xff] }
 0x378   :  { %v902_v44 = vmul.f32 %v3429_v25, %v684_v37  ;;  %v901_v45 = vmul.f32 %v3429_v25, %v683_v38  ;;  %v693_v37 = vld [vmem:[%s5091_s1 + $0x300] sm:$0xff] }
 0x37b   :  { %1181 = vadd.xlane.f32.xlu1 %v1180_v47  ;;  %1178 = vadd.xlane.f32.xlu0 %v1177_v12 }
 0x37f   :  { %1091 = vadd.xlane.f32.xlu1 %v1090_v50  ;;  %1088 = vadd.xlane.f32.xlu0 %v1087_v28  ;;  %v878_v50 = vmul.f32 %v3426_v24, %v660_v0  ;;  %v877_v28 = vmul.f32 %v3426_v24, %v659_v46  ;;  %v686_v0 = vld [vmem:[%s5091_s1 + $0x2c8] sm:$0xff]  ;;  %v685_v46 = vld [vmem:[%s5091_s1 + $0x2c0] sm:$0xff] }
 0x381   :  { %v1132_v24 = vsel %vm165_vm2, %v878_v50, 0.0  ;;  %v1129_v57 = vsel %vm165_vm2, %v877_v28, 0.0  ;;  %v903_v50 = vmul.f32 %v3429_v25, %v685_v46  ;;  %v688_v28 = vld [vmem:[%s5091_s1 + $0x2d8] sm:$0xff] }
 0x383   :  { %1097 = vadd.xlane.f32.xlu1 %v1096_v55  ;;  %1094 = vadd.xlane.f32.xlu0 %v1093_v1 }
 0x387   :  { %1103 = vadd.xlane.f32.xlu1 %v1102_v4  ;;  %1100 = vadd.xlane.f32.xlu0 %v1099_v59  ;;  %v679_v4 = vld [vmem:[%s5091_s1 + $0x290] sm:$0xff] }
 0x388   :  { %v948_v10 = vpop.xlane.xlu0 %947  ;;  %v945_v14 = vpop.xlane.xlu1 %944 }
 0x389   :  { %v3805_v15 = vadd.f32 %v3796_v8, %v948_v10  ;;  %v3808_v16 = vadd.f32 %v3796_v8, %v945_v14  ;;  %v1183_v10 = vsel %vm165_vm2, %v895_v60, 0.0  ;;  %v898_v14 = vmul.f32 %v3429_v25, %v680_v61  ;;  %v690_v60 = vld [vmem:[%s5091_s1 + $0x2e8] sm:$0xff]  ;;  %v689_v61 = vld [vmem:[%s5091_s1 + $0x2e0] sm:$0xff] }
 0x38b   :  { %1109 = vadd.xlane.f32.xlu1 %v1108_v3  ;;  %1106 = vadd.xlane.f32.xlu0 %v1105_v17  ;;  %v897_v3 = vmul.f32 %v3429_v25, %v679_v4  ;;  %v682_v17 = vld [vmem:[%s5091_s1 + $0x2a8] sm:$0xff] }
 0x38c   :  { %v951_v30 = vpop.xlane.xlu0 %950  ;;  %v954_v32 = vpop.xlane.xlu1 %953 }
 0x38d   :  { %v3821_v33 = vadd.f32 %v3796_v8, %v951_v30  ;;  %v3824_v34 = vadd.f32 %v3796_v8, %v954_v32  ;;  %v1192_v30 = vsel %vm165_vm2, %v898_v14, 0.0  ;;  %v1189_v32 = vsel %vm165_vm2, %v897_v3, 0.0  ;;  %v692_v3 = vld [vmem:[%s5091_s1 + $0x2f8] sm:$0xff] }
 0x38e   :  { %v907_v14 = vmul.f32 %v3429_v25, %v689_v61  ;;  %v915_v61 = vmul.f32 %v3432_v26, %v697_v31 }
 0x38f   :  { %1115 = vadd.xlane.f32.xlu1 %v1114_v35  ;;  %1112 = vadd.xlane.f32.xlu0 %v1111_v36  ;;  %v900_v35 = vmul.f32 %v3429_v25, %v682_v17  ;;  %v899_v36 = vmul.f32 %v3429_v25, %v681_v19  ;;  %v691_v17 = vld [vmem:[%s5091_s1 + $0x2f0] sm:$0xff] }
 0x390   :  { %v957_v40 = vpop.xlane.xlu0 %956  ;;  %v960_v41 = vpop.xlane.xlu1 %959 }
 0x391   :  { %v3837_v2 = vadd.f32 %v3796_v8, %v957_v40  ;;  %v3840_v42 = vadd.f32 %v3796_v8, %v960_v41 }
 0x393   :  { %1121 = vadd.xlane.f32.xlu1 %v1120_v43  ;;  %1118 = vadd.xlane.f32.xlu0 %v1117_v7  ;;  %v1198_v43 = vsel %vm165_vm2, %v900_v35, 0.0  ;;  %v1195_v7 = vsel %vm165_vm2, %v899_v36, 0.0  ;;  %v909_v35 = vmul.f32 %v3429_v25, %v691_v17  ;;  %v694_v36 = vld [vmem:[%s5091_s1 + $0x308] sm:$0xff]  ;;  %v1243_v17 = vsel %vm165_vm2, %v915_v61, 0.0 }
 0x394   :  { %v963_v47 = vpop.xlane.xlu0 %962  ;;  %v966_v12 = vpop.xlane.xlu1 %965 }
 0x395   :  { %v3853_v48 = vadd.f32 %v3796_v8, %v963_v47  ;;  %v3856_v49 = vadd.f32 %v3796_v8, %v966_v12  ;;  %v1204_v12 = vsel %vm165_vm2, %v902_v44, 0.0  ;;  %v696_v44 = vld [vmem:[%s5091_s1 + $0x318] sm:$0xff] }
 0x397   :  { %1127 = vadd.xlane.f32.xlu1 %v1126_v18  ;;  %1124 = vadd.xlane.f32.xlu0 %v1123_v20  ;;  %v1201_v18 = vsel %vm165_vm2, %v901_v45, 0.0  ;;  %v904_v20 = vmul.f32 %v3429_v25, %v686_v0  ;;  %v695_v45 = vld [vmem:[%s5091_s1 + $0x310] sm:$0xff] }
 0x398   :  { %v969_v52 = vpop.xlane.xlu0 %968  ;;  %v972_v53 = vpop.xlane.xlu1 %971 }
 0x399   :  { %v3869_v55 = vadd.f32 %v3796_v8, %v969_v52  ;;  %v3872_v1 = vadd.f32 %v3796_v8, %v972_v53  ;;  %v1210_v53 = vsel %vm165_vm2, %v904_v20, 0.0  ;;  %v914_v20 = vmul.f32 %v3432_v26, %v696_v44  ;;  %v704_v44 = vld [vmem:[%s5091_s1 + $0x358] sm:$0xff] }
 0x39b   :  { %1133 = vadd.xlane.f32.xlu1 %v1132_v24  ;;  %1130 = vadd.xlane.f32.xlu0 %v1129_v57  ;;  %v1207_v24 = vsel %vm165_vm2, %v903_v50, 0.0  ;;  %v906_v57 = vmul.f32 %v3429_v25, %v688_v28  ;;  %v913_v50 = vmul.f32 %v3432_v26, %v695_v45  ;;  %v698_v28 = vld [vmem:[%s5091_s1 + $0x328] sm:$0xff]  ;;  %v703_v45 = vld [vmem:[%s5091_s1 + $0x350] sm:$0xff] }
 0x39c   :  { %v975_v59 = vpop.xlane.xlu0 %974  ;;  %v978_v5 = vpop.xlane.xlu1 %977  ;;  %v921_v31 = vmul.f32 %v3432_v26, %v703_v45  ;;  %v709_v45 = vld [vmem:[%s5091_s1 + $0x380] sm:$0xff] }
 0x39d   :  { %v3885_v6 = vadd.f32 %v3796_v8, %v975_v59  ;;  %v3888_v9 = vadd.f32 %v3796_v8, %v978_v5  ;;  %v1216_v5 = vsel %vm165_vm2, %v906_v57, 0.0  ;;  %v1240_v57 = vsel %vm165_vm2, %v914_v20, 0.0 }
 0x39f   :  { %1187 = vadd.xlane.f32.xlu1 %v1186_v13  ;;  %1184 = vadd.xlane.f32.xlu0 %v1183_v10  ;;  %v1213_v13 = vsel %vm165_vm2, %v905_v58, 0.0  ;;  %v908_v10 = vmul.f32 %v3429_v25, %v690_v60  ;;  %v1237_v58 = vsel %vm165_vm2, %v913_v50, 0.0  ;;  %v916_v60 = vmul.f32 %v3432_v26, %v698_v28 }
 0x3a0   :  { %v981_v21 = vpop.xlane.xlu0 %980  ;;  %v984_v22 = vpop.xlane.xlu1 %983  ;;  %v922_v28 = vmul.f32 %v3432_v26, %v704_v44  ;;  %v710_v44 = vld [vmem:[%s5091_s1 + $0x388] sm:$0xff] }
 0x3a1   :  { %v3901_v27 = vadd.f32 %v3796_v8, %v981_v21  ;;  %v3904_v29 = vadd.f32 %v3796_v8, %v984_v22  ;;  %v1222_v22 = vsel %vm165_vm2, %v908_v10, 0.0 }
 0x3a3   :  { %1193 = vadd.xlane.f32.xlu1 %v1192_v30  ;;  %1190 = vadd.xlane.f32.xlu0 %v1189_v32  ;;  %v1219_v30 = vsel %vm165_vm2, %v907_v14, 0.0  ;;  %v910_v32 = vmul.f32 %v3429_v25, %v692_v3  ;;  %v912_v25 = vmul.f32 %v3432_v26, %v694_v36  ;;  %v1246_v3 = vsel %vm165_vm2, %v916_v60, 0.0 }
 0x3a4   :  { %v987_v39 = vpop.xlane.xlu0 %986  ;;  %v990_v11 = vpop.xlane.xlu1 %989 }
 0x3a5   :  { %v3917_v40 = vadd.f32 %v3796_v8, %v987_v39  ;;  %v3920_v41 = vadd.f32 %v3796_v8, %v990_v11  ;;  %v1228_v11 = vsel %vm165_vm2, %v910_v32, 0.0  ;;  %v702_v32 = vld [vmem:[%s5091_s1 + $0x348] sm:$0xff] }
 0x3a7   :  { %1199 = vadd.xlane.f32.xlu1 %v1198_v43  ;;  %1196 = vadd.xlane.f32.xlu0 %v1195_v7  ;;  %v1225_v43 = vsel %vm165_vm2, %v909_v35, 0.0  ;;  %v911_v7 = vmul.f32 %v3432_v26, %v693_v37  ;;  %v701_v35 = vld [vmem:[%s5091_s1 + $0x340] sm:$0xff] }
 0x3a8   :  { %v3932_v8 = vpop.xlane.xlu1 %995  ;;  %v3934_v47 = vpop.xlane.xlu0 %992 }
 0x3ab   :  { %1205 = vadd.xlane.f32.xlu1 %v1204_v12  ;;  %1202 = vadd.xlane.f32.xlu0 %v1201_v18  ;;  %v1234_v12 = vsel %vm165_vm2, %v912_v25, 0.0  ;;  %v1231_v18 = vsel %vm165_vm2, %v911_v7, 0.0  ;;  %v920_v25 = vmul.f32 %v3432_v26, %v702_v32  ;;  %v919_v7 = vmul.f32 %v3432_v26, %v701_v35 }
 0x3ac   :  { %v3946_v51 = vpop.xlane.xlu1 %1001  ;;  %v3948_v52 = vpop.xlane.xlu0 %998 }
 0x3ad   :  { %v1258_v20 = vsel %vm165_vm2, %v920_v25, 0.0  ;;  %v1255_v50 = vsel %vm165_vm2, %v919_v7, 0.0 }
 0x3af   :  { %1211 = vadd.xlane.f32.xlu1 %v1210_v53  ;;  %1208 = vadd.xlane.f32.xlu0 %v1207_v24 }
 0x3b0   :  { %v3960_v4 = vpop.xlane.xlu1 %1007  ;;  %v3962_v59 = vpop.xlane.xlu0 %1004 }
 0x3b3   :  { %1217 = vadd.xlane.f32.xlu1 %v1216_v5  ;;  %1214 = vadd.xlane.f32.xlu0 %v1213_v13  ;;  %v700_v5 = vld [vmem:[%s5091_s1 + $0x338] sm:$0xff]  ;;  %v699_v13 = vld [vmem:[%s5091_s1 + $0x330] sm:$0xff] }
 0x3b4   :  { %v3974_v19 = vpop.xlane.xlu1 %1013  ;;  %v3976_v21 = vpop.xlane.xlu0 %1010 }
 0x3b7   :  { %1223 = vadd.xlane.f32.xlu1 %v1222_v22  ;;  %1220 = vadd.xlane.f32.xlu0 %v1219_v30  ;;  %v918_v22 = vmul.f32 %v3432_v26, %v700_v5  ;;  %v917_v30 = vmul.f32 %v3432_v26, %v699_v13  ;;  %v1264_v5 = vsel %vm165_vm2, %v922_v28, 0.0  ;;  %v1261_v13 = vsel %vm165_vm2, %v921_v31, 0.0 }
 0x3b8   :  { %v3988_v38 = vpop.xlane.xlu1 %1019  ;;  %v3990_v39 = vpop.xlane.xlu0 %1016 }
 0x3bb   :  { %1229 = vadd.xlane.f32.xlu1 %v1228_v11  ;;  %1226 = vadd.xlane.f32.xlu0 %v1225_v43  ;;  %v1252_v11 = vsel %vm165_vm2, %v918_v22, 0.0  ;;  %v1249_v43 = vsel %vm165_vm2, %v917_v30, 0.0  ;;  %v708_v22 = vld [vmem:[%s5091_s1 + $0x378] sm:$0xff]  ;;  %v707_v30 = vld [vmem:[%s5091_s1 + $0x370] sm:$0xff] }
 0x3bc   :  { %v4002_v0 = vpop.xlane.xlu1 %1025  ;;  %v4004_v46 = vpop.xlane.xlu0 %1022  ;;  %v926_v25 = vmul.f32 %v3432_v26, %v708_v22  ;;  %v925_v7 = vmul.f32 %v3432_v26, %v707_v30 }
 0x3be   :  { %v1276_v28 = vsel %vm165_vm2, %v926_v25, 0.0  ;;  %v1273_v31 = vsel %vm165_vm2, %v925_v7, 0.0  ;;  %v713_v25 = vld [vmem:[%s5091_s1 + $0x3a0] sm:$0xff] }
 0x3bf   :  { %1235 = vadd.xlane.f32.xlu1 %v1234_v12  ;;  %1232 = vadd.xlane.f32.xlu0 %v1231_v18 }
 0x3c0   :  { %v4016_v53 = vpop.xlane.xlu1 %1031  ;;  %v4018_v24 = vpop.xlane.xlu0 %1028 }
 0x3c3   :  { %1241 = vadd.xlane.f32.xlu1 %v1240_v57  ;;  %1238 = vadd.xlane.f32.xlu0 %v1237_v58  ;;  %v706_v57 = vld [vmem:[%s5091_s1 + $0x368] sm:$0xff]  ;;  %v705_v58 = vld [vmem:[%s5091_s1 + $0x360] sm:$0xff] }
 0x3c4   :  { %v4030_v10 = vpop.xlane.xlu1 %1037  ;;  %v4032_v14 = vpop.xlane.xlu0 %1034 }
 0x3c7   :  { %1247 = vadd.xlane.f32.xlu1 %v1246_v3  ;;  %1244 = vadd.xlane.f32.xlu0 %v1243_v17  ;;  %v924_v3 = vmul.f32 %v3432_v26, %v706_v57  ;;  %v923_v17 = vmul.f32 %v3432_v26, %v705_v58  ;;  %v928_v26 = vmul.f32 %v3439_v23, %v710_v44  ;;  %v712_v58 = vld [vmem:[%s5091_s1 + $0x398] sm:$0xff] }
 0x3c8   :  { %v4044_v36 = vpop.xlane.xlu1 %1043  ;;  %v4046_v37 = vpop.xlane.xlu0 %1040  ;;  %v927_v57 = vmul.f32 %v3439_v23, %v709_v45  ;;  %v930_v30 = vmul.f32 %v3439_v23, %v712_v58  ;;  %v715_v58 = vld [vmem:[%s5091_s1 + $0x3b0] sm:$0xff] }
 0x3ca   :  { %v1279_v22 = vsel %vm165_vm2, %v927_v57, 0.0  ;;  %v1288_v45 = vsel %vm165_vm2, %v930_v30, 0.0  ;;  %v716_v57 = vld [vmem:[%s5091_s1 + $0x3b8] sm:$0xff] }
 0x3cb   :  { %1253 = vadd.xlane.f32.xlu1 %v1252_v11  ;;  %1250 = vadd.xlane.f32.xlu0 %v1249_v43  ;;  %v1270_v11 = vsel %vm165_vm2, %v924_v3, 0.0  ;;  %v1267_v43 = vsel %vm165_vm2, %v923_v17, 0.0  ;;  %v1282_v17 = vsel %vm165_vm2, %v928_v26, 0.0  ;;  %v931_v26 = vmul.f32 %v3439_v23, %v713_v25  ;;  %v718_v25 = vld [vmem:[%s5091_s1 + $0x3c8] sm:$0xff] }
 0x3cc   :  { %v4058_v12 = vpop.xlane.xlu1 %1049  ;;  %v4060_v18 = vpop.xlane.xlu0 %1046 }
 0x3cd   :  { %v1291_v30 = vsel %vm165_vm2, %v931_v26, 0.0 }
 0x3cf   :  { %1259 = vadd.xlane.f32.xlu1 %v1258_v20  ;;  %1256 = vadd.xlane.f32.xlu0 %v1255_v50 }
 0x3d0   :  { %v4072_v60 = vpop.xlane.xlu1 %1055  ;;  %v4074_v61 = vpop.xlane.xlu0 %1052 }
 0x3d3   :  { %1265 = vadd.xlane.f32.xlu1 %v1264_v5  ;;  %1262 = vadd.xlane.f32.xlu0 %v1261_v13  ;;  %v711_v5 = vld [vmem:[%s5091_s1 + $0x390] sm:$0xff] }
 0x3d4   :  { %v4086_v32 = vpop.xlane.xlu1 %1061  ;;  %v4088_v35 = vpop.xlane.xlu0 %1058 }
 0x3d7   :  { %1271 = vadd.xlane.f32.xlu1 %v1270_v11  ;;  %1268 = vadd.xlane.f32.xlu0 %v1267_v43  ;;  %v929_v11 = vmul.f32 %v3439_v23, %v711_v5  ;;  %v714_v43 = vld [vmem:[%s5091_s1 + $0x3a8] sm:$0xff] }
 0x3d8   :  { %v4100_v20 = vpop.xlane.xlu1 %1067  ;;  %v4102_v50 = vpop.xlane.xlu0 %1064 }
 0x3db   :  { %1277 = vadd.xlane.f32.xlu1 %v1276_v28  ;;  %1274 = vadd.xlane.f32.xlu0 %v1273_v31  ;;  %v1285_v28 = vsel %vm165_vm2, %v929_v11, 0.0  ;;  %v932_v31 = vmul.f32 %v3439_v23, %v714_v43  ;;  %v934_v11 = vmul.f32 %v3439_v23, %v716_v57  ;;  %v933_v43 = vmul.f32 %v3439_v23, %v715_v58 }
 0x3dc   :  { %v4114_v13 = vpop.xlane.xlu1 %1073  ;;  %v4116_v3 = vpop.xlane.xlu0 %1070  ;;  %v936_v57 = vmul.f32 %v3439_v23, %v718_v25 }
 0x3dd   :  { %v1297_v26 = vsel %vm165_vm2, %v933_v43, 0.0 }
 0x3df   :  { %1283 = vadd.xlane.f32.xlu1 %v1282_v17  ;;  %1280 = vadd.xlane.f32.xlu0 %v1279_v22  ;;  %v1294_v22 = vsel %vm165_vm2, %v932_v31, 0.0  ;;  %v1300_v31 = vsel %vm165_vm2, %v934_v11, 0.0  ;;  %v1306_v11 = vsel %vm165_vm2, %v936_v57, 0.0 }
 0x3e0   :  { %v4128_v7 = vpop.xlane.xlu1 %1079  ;;  %v4130_v44 = vpop.xlane.xlu0 %1076 }
 0x3e1   :  { %5107 = vst [vmem:[#allocation9_spill] sm:$0xff] %v4130_v44 }
 0x3e3   :  { %1289 = vadd.xlane.f32.xlu1 %v1288_v45  ;;  %1286 = vadd.xlane.f32.xlu0 %v1285_v28  ;;  %v717_v45 = vld [vmem:[%s5091_s1 + $0x3c0] sm:$0xff] }
 0x3e4   :  { %v4142_v5 = vpop.xlane.xlu1 %1085  ;;  %v4144_v17 = vpop.xlane.xlu0 %1082  ;;  %v935_v58 = vmul.f32 %v3439_v23, %v717_v45 }
 0x3e5   :  { %5108 = vst [vmem:[#allocation10_spill] sm:$0xff] %v4144_v17 }
 0x3e6   :  { %v1303_v43 = vsel %vm165_vm2, %v935_v58, 0.0 }
 0x3e7   :  { %1295 = vadd.xlane.f32.xlu1 %v1294_v22  ;;  %1292 = vadd.xlane.f32.xlu0 %v1291_v30  ;;  %v720_v22 = vld [vmem:[%s5091_s1 + $0x3d8] sm:$0xff]  ;;  %v719_v30 = vld [vmem:[%s5091_s1 + $0x3d0] sm:$0xff] }
 0x3e8   :  { %v4156_v28 = vpop.xlane.xlu1 %1139  ;;  %v4158_v54 = vpop.xlane.xlu0 %1136  ;;  %v938_v25 = vmul.f32 %v3439_v23, %v720_v22  ;;  %v937_v45 = vmul.f32 %v3439_v23, %v719_v30 }
 0x3e9   :  { %5109 = vst [vmem:[#allocation11_spill] sm:$0xff] %v4158_v54 }
 0x3ea   :  { %v1312_v57 = vsel %vm165_vm2, %v938_v25, 0.0  ;;  %v1309_v58 = vsel %vm165_vm2, %v937_v45, 0.0 }
 0x3eb   :  { %1301 = vadd.xlane.f32.xlu1 %v1300_v31  ;;  %1298 = vadd.xlane.f32.xlu0 %v1297_v26  ;;  %v722_v31 = vld [vmem:[%s5091_s1 + $0x3e8] sm:$0xff]  ;;  %v721_v26 = vld [vmem:[%s5091_s1 + $0x3e0] sm:$0xff] }
 0x3ec   :  { %v4170_v62 = vpop.xlane.xlu1 %1145  ;;  %v4172_v54 = vpop.xlane.xlu0 %1142  ;;  %v940_v22 = vmul.f32 %v3439_v23, %v722_v31  ;;  %v939_v30 = vmul.f32 %v3439_v23, %v721_v26 }
 0x3ed   :  { %5110 = vst [vmem:[#allocation12_spill] sm:$0xff] %v4172_v54 }
 0x3ee   :  { %v1318_v25 = vsel %vm165_vm2, %v940_v22, 0.0  ;;  %v1315_v45 = vsel %vm165_vm2, %v939_v30, 0.0 }
 0x3ef   :  { %1307 = vadd.xlane.f32.xlu1 %v1306_v11  ;;  %1304 = vadd.xlane.f32.xlu0 %v1303_v43  ;;  %v724_v11 = vld [vmem:[%s5091_s1 + $0x3f8] sm:$0xff]  ;;  %v723_v43 = vld [vmem:[%s5091_s1 + $0x3f0] sm:$0xff] }
 0x3f0   :  { %v4184_v17 = vpop.xlane.xlu1 %1151  ;;  %v4186_v54 = vpop.xlane.xlu0 %1148  ;;  %v942_v31 = vmul.f32 %v3439_v23, %v724_v11  ;;  %v941_v26 = vmul.f32 %v3439_v23, %v723_v43 }
 0x3f1   :  { %5111 = vst [vmem:[#allocation13_spill] sm:$0xff] %v4184_v17  ;;  %5112 = vst [vmem:[#allocation14_spill] sm:$0xff] %v4186_v54 }
 0x3f2   :  { %v1324_v17 = vsel %vm165_vm2, %v942_v31, 0.0 }
 0x3f3   :  { %1313 = vadd.xlane.f32.xlu1 %v1312_v57  ;;  %1310 = vadd.xlane.f32.xlu0 %v1309_v58 }
 0x3f4   :  { %v4198_v44 = vpop.xlane.xlu1 %1157  ;;  %v4200_v54 = vpop.xlane.xlu0 %1154 }
 0x3f5   :  { %5113 = vst [vmem:[#allocation15_spill] sm:$0xff] %v4198_v44  ;;  %5114 = vst [vmem:[#allocation16_spill] sm:$0xff] %v4200_v54  ;;  %v1321_v44 = vsel %vm165_vm2, %v941_v26, 0.0  ;;  %vm2054_vm2 = vcmask 458112  }
 0x3f7   :  { %1319 = vadd.xlane.f32.xlu1 %v1318_v25  ;;  %1316 = vadd.xlane.f32.xlu0 %v1315_v45 }
 0x3f8   :  { %v4206_v57 = vpop.xlane.xlu1 %1163  ;;  %v4208_v58 = vpop.xlane.xlu0 %1160 }
 0x3fb   :  { %1325 = vadd.xlane.f32.xlu1 %v1324_v17  ;;  %1322 = vadd.xlane.f32.xlu0 %v1321_v44 }
 0x3fc   :  { %v4212_v54 = vpop.xlane.xlu1 %1169  ;;  %v4214_v22 = vpop.xlane.xlu0 %1166 }
 0x400   :  { %v4216_v30 = vpop.xlane.xlu1 %1175  ;;  %v4218_v11 = vpop.xlane.xlu0 %1172 }
 0x401   :  { %5115 = vst [vmem:[#allocation17_spill] sm:$0xff] %v4218_v11 }
 0x404   :  { %v4220_v23 = vpop.xlane.xlu1 %1181  ;;  %v4222_v43 = vpop.xlane.xlu0 %1178 }
 0x405   :  { %5116 = vst [vmem:[#allocation18_spill] sm:$0xff] %v4222_v43 }
 0x408   :  { %v4224_v25 = vpop.xlane.xlu1 %1091  ;;  %v4226_v45 = vpop.xlane.xlu0 %1088 }
 0x409   :  { %5117 = vst [vmem:[#allocation19_spill] sm:$0xff] %v4226_v45 }
 0x40c   :  { %v4228_v31 = vpop.xlane.xlu1 %1097  ;;  %v4230_v17 = vpop.xlane.xlu0 %1094  ;;  %1628 = vperm.xlu1 %2921, %v3805_v15  }
 0x40d   :  { %5118 = vst [vmem:[#allocation20_spill] sm:$0xff] %v4230_v17 }
 0x410   :  { %v4233_v44 = vpop.xlane.xlu1 %1103  ;;  %v4235_v26 = vpop.xlane.xlu0 %1100  ;;  %1631 = vperm.xlu1 %2921, %v3821_v33  }
 0x411   :  { %1625 = vperm.xlu0 %2920, %v3808_v16   ;;  %v1334_v16 = vsub.s32 1, %v3392_v56 }
 0x414   :  { %v4239_v11 = vpop.xlane.xlu1 %1109  ;;  %v4241_v43 = vpop.xlane.xlu0 %1106  ;;  %1634 = vperm.xlu1 %2921, %v3824_v34  }
 0x415   :  { %1652 = vperm.xlu0 %2920, %v3872_v1  }
 0x418   :  { %v4245_v45 = vpop.xlane.xlu1 %1115  ;;  %v4247_v17 = vpop.xlane.xlu0 %1112  ;;  %1637 = vperm.xlu1 %2921, %v3837_v2   ;;  %v4264_v2 = vrot.slane %v3788_v63, %v1334_v16 }
 0x419   :  { %1658 = vperm.xlu0 %2920, %v3888_v9  }
 0x41a   :  { %v1385_v9 = vadd.f32 %v4264_v2, %v3932_v8 }
 0x41c   :  { %v4251_v15 = vpop.xlane.xlu1 %1121  ;;  %v4253_v33 = vpop.xlane.xlu0 %1118  ;;  %1640 = vperm.xlu1 %2921, %v3840_v42  }
 0x41d   :  { %5119 = vst [vmem:[#allocation21_spill] sm:$0xff] %v4253_v33  ;;  %1664 = vperm.xlu0 %2920, %v3904_v29   ;;  %v1387_v29 = vadd.f32 %v4264_v2, %v3946_v51 }
 0x420   :  { %v4258_v34 = vpop.xlane.xlu1 %1127  ;;  %v4260_v1 = vpop.xlane.xlu0 %1124  ;;  %1643 = vperm.xlu1 %2921, %v3853_v48  }
 0x421   :  { %5120 = vst [vmem:[#allocation22_spill] sm:$0xff] %v4260_v1  ;;  %1670 = vperm.xlu0 %2920, %v3920_v41   ;;  %v1389_v41 = vadd.f32 %v4264_v2, %v3960_v4 }
 0x424   :  { %v4269_v33 = vpop.xlane.xlu1 %1133  ;;  %v4271_v42 = vpop.xlane.xlu0 %1130  ;;  %1646 = vperm.xlu1 %2921, %v3856_v49   ;;  %v1391_v49 = vadd.f32 %v4264_v2, %v3974_v19  ;;  %v1395_v19 = vadd.f32 %v4264_v2, %v4002_v0  ;;  %v1388_v0 = vadd.f32 %v4264_v2, %v3962_v59 }
 0x425   :  { %1676 = vperm.xlu0 %2920, %v1385_v9  }
 0x428   :  { %v4276_v1 = vpop.xlane.xlu1 %1187  ;;  %v4278_v48 = vpop.xlane.xlu0 %1184  ;;  %1649 = vperm.xlu1 %2921, %v3869_v55   ;;  %v1393_v55 = vadd.f32 %v4264_v2, %v3988_v38  ;;  %v1386_v38 = vadd.f32 %v4264_v2, %v3948_v52 }
 0x429   :  { %1682 = vperm.xlu0 %2920, %v1387_v29  }
 0x42c   :  { %v4283_v8 = vpop.xlane.xlu1 %1193  ;;  %v4285_v16 = vpop.xlane.xlu0 %1190  ;;  %1655 = vperm.xlu1 %2921, %v3885_v6   ;;  %v1384_v6 = vadd.f32 %v4264_v2, %v3934_v47  ;;  %v1338_v47 = vsub.s32 2, %v3392_v56 }
 0x42d   :  { %1688 = vperm.xlu0 %2920, %v1389_v41  }
 0x430   :  { %v4290_v51 = vpop.xlane.xlu1 %1199  ;;  %v4292_v9 = vpop.xlane.xlu0 %1196  ;;  %1661 = vperm.xlu1 %2921, %v3901_v27  }
 0x431   :  { %1694 = vperm.xlu0 %2920, %v1391_v49   ;;  %v1397_v49 = vadd.f32 %v4264_v2, %v4016_v53  ;;  %v4328_v53 = vrot.slane %v3788_v63, %v1338_v47 }
 0x433   :  { %v1403_v47 = vadd.f32 %v4328_v53, %v4058_v12  ;;  %v1407_v12 = vadd.f32 %v4328_v53, %v4086_v32  ;;  %v1411_v32 = vadd.f32 %v4328_v53, %v4114_v13  ;;  %v1404_v13 = vadd.f32 %v4328_v53, %v4074_v61 }
 0x434   :  { %v4297_v4 = vpop.xlane.xlu1 %1205  ;;  %v4299_v29 = vpop.xlane.xlu0 %1202  ;;  %1667 = vperm.xlu1 %2921, %v3917_v40  }
 0x435   :  { %1700 = vperm.xlu0 %2920, %v1393_v55  }
 0x438   :  { %v4306_v41 = vpop.xlane.xlu1 %1211  ;;  %v4308_v27 = vpop.xlane.xlu0 %1208  ;;  %1673 = vperm.xlu1 %2921, %v1384_v6   ;;  %v1399_v6 = vadd.f32 %v4264_v2, %v4030_v10  ;;  %v1392_v10 = vadd.f32 %v4264_v2, %v3990_v39  ;;  %v1396_v39 = vadd.f32 %v4264_v2, %v4018_v24  ;;  %v1400_v24 = vadd.f32 %v4328_v53, %v4046_v37 }
 0x439   :  { %1706 = vperm.xlu0 %2920, %v1395_v19   ;;  %v1346_v37 = vsub.s32 4, %v3392_v56 }
 0x43c   :  { %v4314_v40 = vpop.xlane.xlu1 %1217  ;;  %v4316_v55 = vpop.xlane.xlu0 %1214  ;;  %1679 = vperm.xlu1 %2921, %v1386_v38   ;;  %v1390_v38 = vadd.f32 %v4264_v2, %v3976_v21  ;;  %v1394_v21 = vadd.f32 %v4264_v2, %v4004_v46  ;;  %v1398_v46 = vadd.f32 %v4264_v2, %v4032_v14  ;;  %v1402_v14 = vadd.f32 %v4328_v53, %v4060_v18 }
 0x43d   :  { %5121 = vst [vmem:[#allocation23_spill] sm:$0xff] %v4316_v55  ;;  %1712 = vperm.xlu0 %2920, %v1397_v49   ;;  %v1401_v49 = vadd.f32 %v4328_v53, %v4044_v36  ;;  %v1405_v36 = vadd.f32 %v4328_v53, %v4072_v60  ;;  %v1409_v60 = vadd.f32 %v4328_v53, %v4100_v20 }
 0x43e   :  { %v1413_v20 = vadd.f32 %v4328_v53, %v4128_v7  ;;  %v4396_v7 = vrot.slane %v3788_v63, %v1346_v37 }
 0x440   :  { %v4323_v19 = vpop.xlane.xlu1 %1223  ;;  %v4325_v52 = vpop.xlane.xlu0 %1220  ;;  %1685 = vperm.xlu1 %2921, %v1388_v0   ;;  %v1435_v37 = vadd.f32 %v4396_v7, %v4170_v62 }
 0x441   :  { %1718 = vperm.xlu0 %2920, %v1399_v6  }
 0x444   :  { %v4334_v55 = vpop.xlane.xlu1 %1229  ;;  %v4336_v59 = vpop.xlane.xlu0 %1226  ;;  %1691 = vperm.xlu1 %2921, %v1390_v38  }
 0x445   :  { %1724 = vperm.xlu0 %2920, %v1401_v49  }
 0x448   :  { %v4342_v0 = vpop.xlane.xlu1 %1235  ;;  %v4344_v6 = vpop.xlane.xlu0 %1232  ;;  %1697 = vperm.xlu1 %2921, %v1392_v10  }
 0x449   :  { %1730 = vperm.xlu0 %2920, %v1403_v47  }
 0x44c   :  { %v4350_v38 = vpop.xlane.xlu1 %1241  ;;  %v4352_v49 = vpop.xlane.xlu0 %1238  ;;  %1703 = vperm.xlu1 %2921, %v1394_v21  }
 0x44d   :  { %1736 = vperm.xlu0 %2920, %v1405_v36  }
 0x450   :  { %v4358_v10 = vpop.xlane.xlu1 %1247  ;;  %v4360_v47 = vpop.xlane.xlu0 %1244  ;;  %1709 = vperm.xlu1 %2921, %v1396_v39  }
 0x451   :  { %1742 = vperm.xlu0 %2920, %v1407_v12  }
 0x454   :  { %v4366_v21 = vpop.xlane.xlu1 %1253  ;;  %v4368_v36 = vpop.xlane.xlu0 %1250  ;;  %1715 = vperm.xlu1 %2921, %v1398_v46  }
 0x455   :  { %1748 = vperm.xlu0 %2920, %v1409_v60   ;;  %v1415_v60 = vadd.f32 %v4328_v53, %v4142_v5  ;;  %v1408_v5 = vadd.f32 %v4328_v53, %v4102_v50  ;;  %v5129_v50 = vld [vmem:[#allocation9_spill] sm:$0xff] }
 0x456   :  { %v1412_v62 = vadd.f32 %v4328_v53, %v5129_v50  ;;  %v5135_v50 = vld [vmem:[#allocation11_spill] sm:$0xff] }
 0x458   :  { %v4374_v39 = vpop.xlane.xlu1 %1259  ;;  %v4376_v12 = vpop.xlane.xlu0 %1256  ;;  %1721 = vperm.xlu1 %2921, %v1400_v24  }
 0x459   :  { %1754 = vperm.xlu0 %2920, %v1411_v32   ;;  %v1406_v32 = vadd.f32 %v4328_v53, %v4088_v35  ;;  %v1410_v35 = vadd.f32 %v4328_v53, %v4116_v3  ;;  %v5132_v3 = vld [vmem:[#allocation10_spill] sm:$0xff] }
 0x45c   :  { %v4382_v2 = vpop.xlane.xlu1 %1265  ;;  %v4384_v46 = vpop.xlane.xlu0 %1262  ;;  %1727 = vperm.xlu1 %2921, %v1402_v14   ;;  %v1433_v14 = vadd.f32 %v4396_v7, %v4156_v28  ;;  %v5126_v28 = vld [vmem:[#allocation13_spill] sm:$0xff] }
 0x45d   :  { %1760 = vperm.xlu0 %2920, %v1413_v20  }
 0x460   :  { %v4391_v24 = vpop.xlane.xlu1 %1271  ;;  %v4393_v18 = vpop.xlane.xlu0 %1268  ;;  %1733 = vperm.xlu1 %2921, %v1404_v13  }
 0x461   :  { %1766 = vperm.xlu0 %2920, %v1415_v60  }
 0x464   :  { %v4402_v20 = vpop.xlane.xlu1 %1277  ;;  %v4404_v61 = vpop.xlane.xlu0 %1274  ;;  %1739 = vperm.xlu1 %2921, %v1406_v32  }
 0x465   :  { %5122 = vst [vmem:[#allocation24_spill] sm:$0xff] %v4402_v20  ;;  %5123 = vst [vmem:[#allocation25_spill] sm:$0xff] %v4404_v61  ;;  %1820 = vperm.xlu0 %2920, %v1433_v14   ;;  %v1437_v20 = vadd.f32 %v4396_v7, %v5126_v28  ;;  %v1441_v28 = vadd.f32 %v4396_v7, %v4206_v57 }
 0x468   :  { %1745 = vperm.xlu1 %2921, %v1408_v5   ;;  %v4410_v13 = vpop.xlane.xlu1 %1283  ;;  %v4412_v60 = vpop.xlane.xlu0 %1280  ;;  %v5130_v5 = vld [vmem:[#allocation15_spill] sm:$0xff] }
 0x469   :  { %5124 = vst [vmem:[#allocation26_spill] sm:$0xff] %v4410_v13  ;;  %5125 = vst [vmem:[#allocation27_spill] sm:$0xff] %v4412_v60  ;;  %1826 = vperm.xlu0 %2920, %v1435_v37   ;;  %v1439_v13 = vadd.f32 %v4396_v7, %v5130_v5  ;;  %v1443_v5 = vadd.f32 %v4396_v7, %v4212_v54  ;;  %v5141_v54 = vld [vmem:[#allocation14_spill] sm:$0xff] }
 0x46c   :  { %1751 = vperm.xlu1 %2921, %v1410_v35   ;;  %v4418_v32 = vpop.xlane.xlu1 %1289  ;;  %v4420_v14 = vpop.xlane.xlu0 %1286  ;;  %v1414_v35 = vadd.f32 %v4328_v53, %v5132_v3  ;;  %v5138_v53 = vld [vmem:[#allocation12_spill] sm:$0xff]  ;;  %v1445_v3 = vadd.f32 %v4396_v7, %v4216_v30 }
 0x46d   :  { %5127 = vst [vmem:[#allocation13_spill] sm:$0xff] %v4418_v32  ;;  %5128 = vst [vmem:[#allocation28_spill] sm:$0xff] %v4420_v14  ;;  %1832 = vperm.xlu0 %2920, %v1437_v20   ;;  %v1434_v57 = vadd.f32 %v4396_v7, %v5138_v53  ;;  %v5143_v30 = vld [vmem:[#allocation16_spill] sm:$0xff] }
 0x470   :  { %1757 = vperm.xlu1 %2921, %v1412_v62   ;;  %v4426_v37 = vpop.xlane.xlu1 %1295  ;;  %v4428_v60 = vpop.xlane.xlu0 %1292  ;;  %v1432_v62 = vadd.f32 %v4396_v7, %v5135_v50  ;;  %v1342_v50 = vsub.s32 3, %v3392_v56 }
 0x471   :  { %5131 = vst [vmem:[#allocation9_spill] sm:$0xff] %v4426_v37  ;;  %1838 = vperm.xlu0 %2920, %v1439_v13  }
 0x472   :  { %v4462_v53 = vrot.slane %v3788_v63, %v1342_v50 }
 0x474   :  { %1763 = vperm.xlu1 %2921, %v1414_v35   ;;  %v4434_v20 = vpop.xlane.xlu1 %1301  ;;  %v4436_v32 = vpop.xlane.xlu0 %1298  ;;  %v1419_v50 = vadd.f32 %v4462_v53, %v4228_v31 }
 0x475   :  { %5133 = vst [vmem:[#allocation15_spill] sm:$0xff] %v4434_v20  ;;  %5134 = vst [vmem:[#allocation10_spill] sm:$0xff] %v4436_v32  ;;  %1844 = vperm.xlu0 %2920, %v1441_v28  }
 0x478   :  { %1817 = vperm.xlu1 %2921, %v1432_v62   ;;  %v4442_v13 = vpop.xlane.xlu1 %1307  ;;  %v4444_v37 = vpop.xlane.xlu0 %1304  ;;  %v1436_v62 = vadd.f32 %v4396_v7, %v5141_v54 }
 0x479   :  { %5136 = vst [vmem:[#allocation11_spill] sm:$0xff] %v4442_v13  ;;  %5137 = vst [vmem:[#allocation29_spill] sm:$0xff] %v4444_v37  ;;  %1850 = vperm.xlu0 %2920, %v1443_v5   ;;  %v1447_v5 = vadd.f32 %v4396_v7, %v4220_v23  ;;  %v1440_v23 = vadd.f32 %v4396_v7, %v4208_v58  ;;  %v5147_v58 = vld [vmem:[#allocation17_spill] sm:$0xff]  ;;  %v1354_v13 = vsub.s32 6, %v3392_v56 }
 0x47a   :  { %v1444_v31 = vadd.f32 %v4396_v7, %v5147_v58  ;;  %v5149_v58 = vld [vmem:[#allocation19_spill] sm:$0xff] }
 0x47c   :  { %1823 = vperm.xlu1 %2921, %v1434_v57   ;;  %v4450_v35 = vpop.xlane.xlu1 %1313  ;;  %v4452_v28 = vpop.xlane.xlu0 %1310  ;;  %v1438_v57 = vadd.f32 %v4396_v7, %v5143_v30  ;;  %v1442_v30 = vadd.f32 %v4396_v7, %v4214_v22  ;;  %v5148_v22 = vld [vmem:[#allocation18_spill] sm:$0xff] }
 0x47d   :  { %5139 = vst [vmem:[#allocation12_spill] sm:$0xff] %v4450_v35  ;;  %5140 = vst [vmem:[#allocation30_spill] sm:$0xff] %v4452_v28  ;;  %1856 = vperm.xlu0 %2920, %v1445_v3   ;;  %v1417_v3 = vadd.f32 %v4462_v53, %v4224_v25  ;;  %v1421_v25 = vadd.f32 %v4462_v53, %v4233_v44  ;;  %v1446_v44 = vadd.f32 %v4396_v7, %v5148_v22  ;;  %v5151_v7 = vld [vmem:[#allocation20_spill] sm:$0xff] }
 0x47e   :  { %v1429_v22 = vadd.f32 %v4462_v53, %v4258_v34 }
 0x480   :  { %1829 = vperm.xlu1 %2921, %v1436_v62   ;;  %v4459_v37 = vpop.xlane.xlu1 %1319  ;;  %v4466_v28 = vpop.xlane.xlu0 %1316 }
 0x481   :  { %5142 = vst [vmem:[#allocation14_spill] sm:$0xff] %v4459_v37  ;;  %1862 = vperm.xlu0 %2920, %v1447_v5   ;;  %5144 = vst [vmem:[#allocation16_spill] sm:$0xff] %v4466_v28 }
 0x484   :  { %1835 = vperm.xlu1 %2921, %v1438_v57   ;;  %v4470_v54 = vpop.xlane.xlu1 %1325  ;;  %v4476_v62 = vpop.xlane.xlu0 %1322 }
 0x485   :  { %5145 = vst [vmem:[#allocation31_spill] sm:$0xff] %v4470_v54  ;;  %1772 = vperm.xlu0 %2920, %v1417_v3   ;;  %5146 = vst [vmem:[#allocation32_spill] sm:$0xff] %v4476_v62 }
 0x488   :  { %1841 = vperm.xlu1 %2921, %v1440_v23   ;;  %v4478_v5 = vpop.permute.xlu1 %1628  ;;  %v1423_v23 = vadd.f32 %v4462_v53, %v4239_v11  ;;  %v1416_v11 = vadd.f32 %v4462_v53, %v5149_v58  ;;  %v1350_v58 = vsub.s32 5, %v3392_v56 }
 0x489   :  { %1778 = vperm.xlu0 %2920, %v1419_v50  }
 0x48a   :  { %v4528_v34 = vrot.slane %v3788_v63, %v1350_v58 }
 0x48c   :  { %1847 = vperm.xlu1 %2921, %v1442_v30   ;;  %v4484_v57 = vpop.permute.xlu1 %1631  ;;  %v4486_v3 = vpop.permute.xlu0 %1625  ;;  %v1425_v30 = vadd.f32 %v4462_v53, %v4245_v45  ;;  %v1418_v45 = vadd.f32 %v4462_v53, %v5151_v7  ;;  %v1451_v58 = vadd.f32 %v4528_v34, %v4283_v8 }
 0x48d   :  { %1784 = vperm.xlu0 %2920, %v1421_v25  }
 0x490   :  { %1853 = vperm.xlu1 %2921, %v1444_v31   ;;  %v4492_v50 = vpop.permute.xlu1 %1634  ;;  %v4494_v54 = vpop.permute.xlu0 %1652  ;;  %v1427_v31 = vadd.f32 %v4462_v53, %v4251_v15  ;;  %v1420_v15 = vadd.f32 %v4462_v53, %v4235_v26 }
 0x491   :  { %1790 = vperm.xlu0 %2920, %v1423_v23  }
 0x494   :  { %1859 = vperm.xlu1 %2921, %v1446_v44   ;;  %v4500_v25 = vpop.permute.xlu1 %1637  ;;  %v4502_v20 = vpop.permute.xlu0 %1658 }
 0x495   :  { %1796 = vperm.xlu0 %2920, %v1425_v30  }
 0x498   :  { %1769 = vperm.xlu1 %2921, %v1416_v11   ;;  %v4508_v23 = vpop.permute.xlu1 %1640  ;;  %v4510_v32 = vpop.permute.xlu0 %1664  ;;  %v1431_v11 = vadd.f32 %v4462_v53, %v4269_v33  ;;  %v1424_v33 = vadd.f32 %v4462_v53, %v4247_v17  ;;  %v5154_v17 = vld [vmem:[#allocation22_spill] sm:$0xff] }
 0x499   :  { %5150 = vst [vmem:[#allocation17_spill] sm:$0xff] %v4510_v32  ;;  %1802 = vperm.xlu0 %2920, %v1427_v31   ;;  %v1428_v8 = vadd.f32 %v4462_v53, %v5154_v17 }
 0x49c   :  { %1775 = vperm.xlu1 %2921, %v1418_v45   ;;  %v4516_v44 = vpop.permute.xlu1 %1643  ;;  %v4518_v30 = vpop.permute.xlu0 %1670  ;;  %v1422_v45 = vadd.f32 %v4462_v53, %v4241_v43  ;;  %v5153_v43 = vld [vmem:[#allocation21_spill] sm:$0xff] }
 0x49d   :  { %5152 = vst [vmem:[#allocation18_spill] sm:$0xff] %v4518_v30  ;;  %1808 = vperm.xlu0 %2920, %v1429_v22   ;;  %v1449_v22 = vadd.f32 %v4528_v34, %v4276_v1  ;;  %v1426_v1 = vadd.f32 %v4462_v53, %v5153_v43  ;;  %v1459_v30 = vadd.f32 %v4528_v34, %v4314_v40 }
 0x4a0   :  { %1781 = vperm.xlu1 %2921, %v1420_v15   ;;  %v4525_v31 = vpop.permute.xlu1 %1646  ;;  %v1677_v7 = vpop.permute.xlu0 %1676 }
 0x4a1   :  { %1814 = vperm.xlu0 %2920, %v1431_v11  }
 0x4a4   :  { %1787 = vperm.xlu1 %2921, %v1422_v45   ;;  %v4534_v62 = vpop.permute.xlu1 %1649  ;;  %v4536_v26 = vpop.permute.xlu0 %1682  ;;  %v1453_v45 = vadd.f32 %v4528_v34, %v4290_v51  ;;  %v1430_v51 = vadd.f32 %v4462_v53, %v4271_v42 }
 0x4a5   :  { %1868 = vperm.xlu0 %2920, %v1449_v22  }
 0x4a8   :  { %1793 = vperm.xlu1 %2921, %v1424_v33   ;;  %v4542_v15 = vpop.permute.xlu1 %1655  ;;  %v4544_v11 = vpop.permute.xlu0 %1688  ;;  %v5155_v33 = vlaneseq }
 0x4a9   :  { %1874 = vperm.xlu0 %2920, %v1451_v58   ;;  %v1455_v58 = vadd.f32 %v4528_v34, %v4297_v4 }
 0x4aa   :  { %v4557_v37 = vand.u32 127, %v5155_v33 }
 0x4ac   :  { %1799 = vperm.xlu1 %2921, %v1426_v1   ;;  %v4550_v22 = vpop.permute.xlu1 %1661  ;;  %v4552_v14 = vpop.permute.xlu0 %1694  ;;  %v2014_v1 = vadd.s32 4294967288, %v4557_v37  ;;  %v2021_v17 = vadd.s32 4294967280, %v4557_v37  ;;  %v4573_v33 = vsub.s32 %v4557_v37, %v3392_v56  ;;  %v2028_v53 = vadd.s32 4294967272, %v4557_v37 }
 0x4ad   :  { %1880 = vperm.xlu0 %2920, %v1453_v45   ;;  %v1457_v45 = vadd.f32 %v4528_v34, %v4306_v41  ;;  %v2049_v61 = vadd.s32 4294967248, %v4557_v37 }
 0x4ae   :  { %v4580_v42 = vsub.s32 %v2014_v1, %v3392_v56  ;;  %v4587_v35 = vsub.s32 %v2021_v17, %v3392_v56  ;;  %v4597_v40 = vsub.s32 %v2028_v53, %v3392_v56  ;;  %v2042_v17 = vadd.s32 4294967256, %v4557_v37 }
 0x4b0   :  { %1805 = vperm.xlu1 %2921, %v1428_v8   ;;  %v4561_v43 = vpop.permute.xlu1 %1667  ;;  %v4563_v28 = vpop.permute.xlu0 %1700 }
 0x4b1   :  { %5156 = vst [vmem:[#allocation19_spill] sm:$0xff] %v4561_v43  ;;  %1886 = vperm.xlu0 %2920, %v1455_v58   ;;  %v1448_v58 = vadd.f32 %v4528_v34, %v4278_v48 }
 0x4b4   :  { %1811 = vperm.xlu1 %2921, %v1430_v51   ;;  %v1674_v4 = vpop.permute.xlu1 %1673  ;;  %v4575_v8 = vpop.permute.xlu0 %1706  ;;  %v2035_v51 = vadd.s32 4294967264, %v4557_v37 }
 0x4b5   :  { %1892 = vperm.xlu0 %2920, %v1457_v45   ;;  %v2122_v41 = vrot.slane %v1674_v4, %v4573_v33  ;;  %v2126_v45 = vrot.slane %v1677_v7, %v4580_v42  ;;  %v1450_v4 = vadd.f32 %v4528_v34, %v4285_v16  ;;  %v1461_v7 = vadd.f32 %v4528_v34, %v4323_v19 }
 0x4b6   :  { %v2136_v16 = vrot.slane %v4536_v26, %v4597_v40 }
 0x4b7   :  { %v2127_v43 = vsel %vm2019_vm13, %v2126_v45, %v2122_v41  ;;  %v1452_v41 = vadd.f32 %v4528_v34, %v4292_v9  ;;  %v1463_v45 = vadd.f32 %v4528_v34, %v4334_v55 }
 0x4b8   :  { %1865 = vperm.xlu1 %2921, %v1448_v58   ;;  %v1680_v32 = vpop.permute.xlu1 %1679  ;;  %v4591_v48 = vpop.permute.xlu0 %1712  ;;  %v4604_v58 = vsub.s32 %v2035_v51, %v3392_v56  ;;  %v4617_v51 = vsub.s32 %v2042_v17, %v3392_v56 }
 0x4b9   :  { %v2131_v1 = vrot.slane %v1680_v32, %v4587_v35  ;;  %1898 = vperm.xlu0 %2920, %v1459_v30  }
 0x4ba   :  { %v2146_v9 = vrot.slane %v4544_v11, %v4617_v51 }
 0x4bb   :  { %v2132_v32 = vsel %vm2026_vm14, %v2131_v1, %v2127_v43  ;;  %v2056_v43 = vadd.s32 4294967240, %v4557_v37  ;;  %v4624_v1 = vsub.s32 %v2049_v61, %v3392_v56  ;;  %v1454_v61 = vadd.f32 %v4528_v34, %v4299_v29 }
 0x4bc   :  { %1871 = vperm.xlu1 %2921, %v1450_v4   ;;  %v1686_v30 = vpop.permute.xlu1 %1685  ;;  %v4610_v53 = vpop.permute.xlu0 %1718  ;;  %v2137_v26 = vsel %vm2033_vm15, %v2136_v16, %v2132_v32  ;;  %v2063_v4 = vadd.s32 4294967232, %v4557_v37  ;;  %v2070_v32 = vadd.s32 4294967224, %v4557_v37 }
 0x4bd   :  { %5157 = vst [vmem:[#allocation20_spill] sm:$0xff] %v4610_v53  ;;  %v2141_v19 = vrot.slane %v1686_v30, %v4604_v58  ;;  %1904 = vperm.xlu0 %2920, %v1461_v7   ;;  %v4633_v53 = vrot.slane %v3788_v63, %v1354_v13  ;;  %v4640_v16 = vsub.s32 %v2056_v43, %v3392_v56  ;;  %v2084_v43 = vadd.s32 4294967208, %v4557_v37 }
 0x4be   :  { %v4646_v13 = vsub.s32 %v2063_v4, %v3392_v56  ;;  %v4659_v4 = vsub.s32 %v2070_v32, %v3392_v56 }
 0x4bf   :  { %v2142_v7 = vsel %vm2040_vm0, %v2141_v19, %v2137_v26  ;;  %v1465_v19 = vadd.f32 %v4633_v53, %v4342_v0  ;;  %v1456_v0 = vadd.f32 %v4528_v34, %v4308_v27 }
 0x4c0   :  { %1877 = vperm.xlu1 %2921, %v1452_v41   ;;  %v1692_v17 = vpop.permute.xlu1 %1691  ;;  %v4630_v30 = vpop.permute.xlu0 %1724  ;;  %v2147_v11 = vsel %vm2047_vm1, %v2146_v9, %v2142_v7  ;;  %v2077_v41 = vadd.s32 4294967216, %v4557_v37 }
 0x4c1   :  { %v2151_v55 = vrot.slane %v1692_v17, %v4624_v1  ;;  %1910 = vperm.xlu0 %2920, %v1463_v45   ;;  %v2156_v45 = vrot.slane %v4552_v14, %v4640_v16  ;;  %v1467_v14 = vadd.f32 %v4633_v53, %v4350_v38 }
 0x4c3   :  { %v2152_v26 = vsel %vm2054_vm2, %v2151_v55, %v2147_v11  ;;  %v4665_v55 = vsub.s32 %v2077_v41, %v3392_v56  ;;  %v5158_v41 = vld [vmem:[#allocation23_spill] sm:$0xff] }
 0x4c4   :  { %1883 = vperm.xlu1 %2921, %v1454_v61   ;;  %v1698_v29 = vpop.permute.xlu1 %1697  ;;  %v4652_v17 = vpop.permute.xlu0 %1730  ;;  %v2157_v9 = vsel %vm2061_vm3, %v2156_v45, %v2152_v26  ;;  %v2091_v61 = vadd.s32 4294967200, %v4557_v37  ;;  %v1458_v26 = vadd.f32 %v4528_v34, %v5158_v41  ;;  %v2098_v45 = vadd.s32 4294967192, %v4557_v37 }
 0x4c5   :  { %v2161_v7 = vrot.slane %v1698_v29, %v4646_v13  ;;  %1916 = vperm.xlu0 %2920, %v1465_v19   ;;  %v2166_v19 = vrot.slane %v4563_v28, %v4659_v4  ;;  %v4674_v29 = vsub.s32 %v2084_v43, %v3392_v56  ;;  %v1469_v28 = vadd.f32 %v4633_v53, %v4358_v10 }
 0x4c6   :  { %v2105_v43 = vadd.s32 4294967184, %v4557_v37  ;;  %v1460_v10 = vadd.f32 %v4528_v34, %v4325_v52 }
 0x4c7   :  { %v2162_v11 = vsel %vm2068_vm4, %v2161_v7, %v2157_v9 }
 0x4c8   :  { %1889 = vperm.xlu1 %2921, %v1456_v0   ;;  %v1704_v27 = vpop.permute.xlu1 %1703  ;;  %v4671_v32 = vpop.permute.xlu0 %1736  ;;  %v2167_v7 = vsel %vm2075_vm5, %v2166_v19, %v2162_v11  ;;  %v4684_v0 = vsub.s32 %v2091_v61, %v3392_v56  ;;  %v4696_v61 = vsub.s32 %v2098_v45, %v3392_v56 }
 0x4c9   :  { %v2171_v38 = vrot.slane %v1704_v27, %v4665_v55  ;;  %1922 = vperm.xlu0 %2920, %v1467_v14   ;;  %v2176_v14 = vrot.slane %v4575_v8, %v4674_v29  ;;  %v1471_v8 = vadd.f32 %v4633_v53, %v4366_v21 }
 0x4cb   :  { %v2172_v9 = vsel %vm2082_vm12, %v2171_v38, %v2167_v7  ;;  %v4702_v38 = vsub.s32 %v2105_v43, %v3392_v56  ;;  %v2186_v7 = vrot.slane %v4591_v48, %v4696_v61  ;;  %v1472_v43 = vadd.f32 %v4633_v53, %v4376_v12 }
 0x4cc   :  { %1895 = vperm.xlu1 %2921, %v1458_v26   ;;  %v1710_v27 = vpop.permute.xlu1 %1709  ;;  %v4690_v41 = vpop.permute.xlu0 %1742  ;;  %v2177_v19 = vsel %vm5105_vm11, %v2176_v14, %v2172_v9  ;;  %v1462_v9 = vadd.f32 %v4528_v34, %v4336_v59  ;;  %v1473_v59 = vadd.f32 %v4633_v53, %v4374_v39  ;;  %v2013_v34 = vrot.slane %v4486_v3, %v4573_v33 }
 0x4cd   :  { %v2181_v11 = vrot.slane %v1710_v27, %v4684_v0  ;;  %1928 = vperm.xlu0 %2920, %v1469_v28   ;;  %v2205_v12 = vrot.slane %v4630_v30, %v4580_v42  ;;  %v2025_v39 = vrot.slane %v4484_v57, %v4587_v35  ;;  %v1474_v30 = vadd.f32 %v4633_v53, %v4384_v46 }
 0x4ce   :  { %v2046_v46 = vrot.slane %v4508_v23, %v4617_v51  ;;  %v2060_v23 = vrot.slane %v4525_v31, %v4640_v16 }
 0x4cf   :  { %v2182_v26 = vsel %vm2096_vm10, %v2181_v11, %v2177_v19  ;;  %v1464_v11 = vadd.f32 %v4633_v53, %v4344_v6 }
 0x4d0   :  { %1901 = vperm.xlu1 %2921, %v1460_v10   ;;  %v1716_v28 = vpop.permute.xlu1 %1715  ;;  %v4707_v52 = vpop.permute.xlu0 %1748  ;;  %v2187_v21 = vsel %vm2103_vm9, %v2186_v7, %v2182_v26  ;;  %v2018_v26 = vrot.slane %v4478_v5, %v4580_v42  ;;  %v1466_v7 = vadd.f32 %v4633_v53, %v4352_v49  ;;  %v2215_v49 = vrot.slane %v4652_v17, %v4597_v40 }
 0x4d1   :  { %v2191_v45 = vrot.slane %v1716_v28, %v4702_v38  ;;  %1934 = vperm.xlu0 %2920, %v1471_v8  }
 0x4d2   :  { %v2020_v28 = vsel %vm2019_vm13, %v2018_v26, %v2013_v34  ;;  %v1358_v34 = vsub.s32 7, %v3392_v56 }
 0x4d3   :  { %v4716_v14 = vsel %vm2110_vm8, %v2191_v45, %v2187_v21  ;;  %v2032_v45 = vrot.slane %v4492_v50, %v4597_v40  ;;  %v1468_v50 = vadd.f32 %v4633_v53, %v4360_v47 }
 0x4d4   :  { %1907 = vperm.xlu1 %2921, %v1462_v9   ;;  %v1722_v48 = vpop.permute.xlu1 %1721  ;;  %v4718_v27 = vpop.permute.xlu0 %1754  ;;  %v2039_v9 = vrot.slane %v4500_v25, %v4604_v58  ;;  %v2053_v25 = vrot.slane %v4516_v44, %v4624_v1  ;;  %v2225_v44 = vrot.slane %v4671_v32, %v4617_v51 }
 0x4d5   :  { %1937 = vperm.xlu0 %2920, %v1472_v43   ;;  %v2201_v10 = vrot.slane %v1722_v48, %v4573_v33  ;;  %v2027_v48 = vsel %vm2026_vm14, %v2025_v39, %v2020_v28 }
 0x4d7   :  { %v2206_v3 = vsel %vm2019_vm13, %v2205_v12, %v2201_v10  ;;  %v2034_v10 = vsel %vm2033_vm15, %v2032_v45, %v2027_v48  ;;  %v2067_v12 = vrot.slane %v4534_v62, %v4646_v13  ;;  %v1476_v62 = vadd.f32 %v4633_v53, %v4393_v18 }
 0x4d8   :  { %1913 = vperm.xlu1 %2921, %v1464_v11   ;;  %v1728_v19 = vpop.permute.xlu1 %1727  ;;  %v4729_v8 = vpop.permute.xlu0 %1760  ;;  %v1475_v11 = vadd.f32 %v4633_v53, %v4382_v2  ;;  %v2041_v47 = vsel %vm2040_vm0, %v2039_v9, %v2034_v10  ;;  %v2081_v45 = vrot.slane %v4542_v15, %v4665_v55  ;;  %v2074_v18 = vrot.slane %v4494_v54, %v4659_v4 }
 0x4d9   :  { %v2210_v6 = vrot.slane %v1728_v19, %v4587_v35  ;;  %1940 = vperm.xlu0 %2920, %v1473_v59   ;;  %v2048_v26 = vsel %vm2047_vm1, %v2046_v46, %v2041_v47  ;;  %v1477_v15 = vadd.f32 %v4633_v53, %v4391_v24  ;;  %v2095_v54 = vrot.slane %v4550_v22, %v4684_v0  ;;  %v5161_v47 = vld [vmem:[#allocation19_spill] sm:$0xff] }
 0x4da   :  { %v2112_v24 = vadd.s32 4294967176, %v4557_v37  ;;  %v2255_v22 = vrot.slane %v4718_v27, %v4674_v29  ;;  %v5162_v27 = vld [vmem:[#allocation17_spill] sm:$0xff] }
 0x4db   :  { %v2211_v5 = vsel %vm2026_vm14, %v2210_v6, %v2206_v3  ;;  %v1470_v6 = vadd.f32 %v4633_v53, %v4368_v36  ;;  %v2235_v36 = vrot.slane %v4690_v41, %v4640_v16 }
 0x4dc   :  { %1919 = vperm.xlu1 %2921, %v1466_v7   ;;  %v1734_v57 = vpop.permute.xlu1 %1733  ;;  %v4749_v21 = vpop.permute.xlu0 %1766  ;;  %v2216_v17 = vsel %vm2033_vm15, %v2215_v49, %v2211_v5  ;;  %v2055_v7 = vsel %vm2054_vm2, %v2053_v25, %v2048_v26  ;;  %v2088_v25 = vrot.slane %v4502_v20, %v4674_v29 }
 0x4dd   :  { %v2220_v43 = vrot.slane %v1734_v57, %v4604_v58  ;;  %1943 = vperm.xlu0 %2920, %v1474_v30   ;;  %v2062_v32 = vsel %vm2061_vm3, %v2060_v23, %v2055_v7  ;;  %v4785_v30 = vrot.slane %v3788_v63, %v1358_v34  ;;  %v5160_v23 = vld [vmem:[#allocation25_spill] sm:$0xff] }
 0x4de   :  { %v2069_v28 = vsel %vm2068_vm4, %v2067_v12, %v2062_v32  ;;  %v2109_v12 = vrot.slane %v5161_v47, %v4702_v38  ;;  %v2265_v32 = vrot.slane %v4729_v8, %v4696_v61  ;;  %v5166_v8 = vld [vmem:[#allocation18_spill] sm:$0xff] }
 0x4df   :  { %v2221_v59 = vsel %vm2040_vm0, %v2220_v43, %v2216_v17  ;;  %v1484_v63 = vadd.f32 %v4785_v30, %v4428_v60  ;;  %v2076_v41 = vsel %vm2075_vm5, %v2074_v18, %v2069_v28 }
 0x4e0   :  { %1925 = vperm.xlu1 %2921, %v1468_v50   ;;  %v1740_v19 = vpop.permute.xlu1 %1739  ;;  %v4772_v2 = vpop.permute.xlu0 %1820  ;;  %v2226_v39 = vsel %vm2047_vm1, %v2225_v44, %v2221_v59  ;;  %v2083_v43 = vsel %vm2082_vm12, %v2081_v45, %v2076_v41  ;;  %v2245_v50 = vrot.slane %v4707_v52, %v4659_v4  ;;  %v1478_v59 = vadd.f32 %v4633_v53, %v5160_v23 }
 0x4e1   :  { %v2230_v31 = vrot.slane %v1740_v19, %v4624_v1  ;;  %1946 = vperm.xlu0 %2920, %v1475_v11   ;;  %v5159_v11 = vld [vmem:[#allocation11_spill] sm:$0xff]  ;;  %v2090_v34 = vsel %vm5105_vm11, %v2088_v25, %v2083_v43  ;;  %v5167_v43 = vld [vmem:[#allocation16_spill] sm:$0xff] }
 0x4e2   :  { %v1489_v10 = vadd.f32 %v4785_v30, %v5159_v11  ;;  %v2097_v37 = vsel %vm2096_vm10, %v2095_v54, %v2090_v34  ;;  %v1492_v54 = vadd.f32 %v4785_v30, %v5167_v43 }
 0x4e3   :  { %v2231_v3 = vsel %vm2054_vm2, %v2230_v31, %v2226_v39  ;;  %v2102_v31 = vrot.slane %v5162_v27, %v4696_v61  ;;  %v5163_v39 = vld [vmem:[#allocation12_spill] sm:$0xff] }
 0x4e4   :  { %1931 = vperm.xlu1 %2921, %v1470_v6   ;;  %v1746_v5 = vpop.permute.xlu1 %1745  ;;  %v4792_v9 = vpop.permute.xlu0 %1826  ;;  %v2236_v57 = vsel %vm2061_vm3, %v2235_v36, %v2231_v3  ;;  %v4833_v6 = vsub.s32 %v2112_v24, %v3392_v56  ;;  %v5164_v3 = vld [vmem:[#allocation27_spill] sm:$0xff]  ;;  %v5165_v36 = vld [vmem:[#allocation20_spill] sm:$0xff] }
 0x4e5   :  { %v2240_v49 = vrot.slane %v1746_v5, %v4646_v13  ;;  %1949 = vperm.xlu0 %2920, %v1476_v62   ;;  %v1491_v62 = vadd.f32 %v4785_v30, %v5163_v39  ;;  %v1480_v28 = vadd.f32 %v4785_v30, %v5164_v3  ;;  %v2104_v45 = vsel %vm2103_vm9, %v2102_v31, %v2097_v37  ;;  %v5172_v39 = vld [vmem:[#allocation13_spill] sm:$0xff] }
 0x4e6   :  { %v2196_v5 = vrot.slane %v5165_v36, %v4833_v6  ;;  %v2111_v18 = vsel %vm2110_vm8, %v2109_v12, %v2104_v45  ;;  %v2373_v31 = vrot.slane %v4792_v9, %v4597_v40 }
 0x4e7   :  { %v2241_v46 = vsel %vm2068_vm4, %v2240_v49, %v2236_v57 }
 0x4e8   :  { %v1752_v48 = vpop.permute.xlu1 %1751  ;;  %1973 = vperm.xlu1 %2921, %v1484_v63   ;;  %v4809_v60 = vpop.permute.xlu0 %1832  ;;  %v2246_v52 = vsel %vm2075_vm5, %v2245_v50, %v2241_v46  ;;  %v2275_v50 = vrot.slane %v4749_v21, %v4833_v6 }
 0x4e9   :  { %v2250_v17 = vrot.slane %v1752_v48, %v4665_v55  ;;  %1952 = vperm.xlu0 %2920, %v1477_v15   ;;  %v2116_v15 = vrot.slane %v5166_v8, %v4833_v6  ;;  %v5168_v48 = vld [vmem:[#allocation26_spill] sm:$0xff]  ;;  %v2383_v9 = vrot.slane %v4809_v60, %v4617_v51 }
 0x4ea   :  { %v1481_v25 = vadd.f32 %v4785_v30, %v5168_v48 }
 0x4eb   :  { %v2251_v20 = vsel %vm2082_vm12, %v2250_v17, %v2246_v52  ;;  %v2363_v52 = vrot.slane %v4772_v2, %v4580_v42  ;;  %v5171_v2 = vld [vmem:[#allocation32_spill] sm:$0xff] }
 0x4ec   :  { %v1758_v44 = vpop.permute.xlu1 %1757  ;;  %v2256_v19 = vsel %vm5105_vm11, %v2255_v22, %v2251_v20  ;;  %1988 = vperm.xlu1 %2921, %v1489_v10   ;;  %v4828_v26 = vpop.permute.xlu0 %1838  ;;  %vm2117_vm11 = vcmask 1048512   ;;  %v5170_v20 = vld [vmem:[#allocation28_spill] sm:$0xff]  ;;  %v1494_v27 = vadd.f32 %v4785_v30, %v5171_v2 }
 0x4ed   :  { %v2260_v7 = vrot.slane %v1758_v44, %v4684_v0  ;;  %1955 = vperm.xlu0 %2920, %v1478_v59   ;;  %v2197_v41 = vsel %vm2117_vm11, %v2196_v5, %v4716_v14  ;;  %v2118_v24 = vsel %vm2117_vm11, %v2116_v15, %v2111_v18  ;;  %v5169_v59 = vld [vmem:[#allocation14_spill] sm:$0xff]  ;;  %v1482_v37 = vadd.f32 %v4785_v30, %v5170_v20  ;;  %v5173_v5 = vld [vmem:[#allocation8_spill] sm:$0xff]  ;;  %v5174_v18 = vld [vmem:[#allocation9_spill] sm:$0xff] }
 0x4ee   :  { %v2672_v11 = vsel %vm418_vm6, %v2197_v41, %v2118_v24  ;;  %v1493_v34 = vadd.f32 %v4785_v30, %v5169_v59  ;;  %v2393_v43 = vrot.slane %v4828_v26, %v4640_v16  ;;  %vm5178_vm6 = vcmask 786112  }
 0x4ef   :  { %v2261_v56 = vsel %vm2096_vm10, %v2260_v7, %v2256_v19  ;;  %v2739_v7 = vld [vmem:[%s5096_s6 + $0x4] ss:$0 sm:$0xff]  ;;  %s2972_s6 = smov [#allocation4]  }
 0x4f0   :  { %v1764_v49 = vpop.permute.xlu1 %1763  ;;  %v2266_v63 = vsel %vm2103_vm9, %v2265_v32, %v2261_v56  ;;  %1994 = vperm.xlu1 %2921, %v1491_v62   ;;  %v1845_v57 = vpop.permute.xlu0 %1844  ;;  %v1483_v62 = vadd.f32 %v4785_v30, %v5172_v39  ;;  %v2692_v56 = vadd.f32 %v2739_v7, %v5173_v5  ;;  %v5179_v7 = vld [vmem:[#allocation30_spill] sm:$0xff]  ;;  %v5180_v5 = vld [vmem:[#allocation24_spill] sm:$0xff]  ;;  %s2715_s14 = sshll.u32 %s2972_s6, 4  ;;  %s2716_s14 = int_to_ptr.vmem [resolvable:$true] %s2715_s14 }
 0x4f1   :  { %v2270_v46 = vrot.slane %v1764_v49, %v4702_v38  ;;  %1961 = vperm.xlu0 %2920, %v1480_v28   ;;  %v1485_v49 = vadd.f32 %v4785_v30, %v5174_v18  ;;  %v1490_v39 = vadd.f32 %v4785_v30, %v5179_v7  ;;  %s2922_s5 = scalar_lea.vmem %s2716_s14, 128  ;;  %p2927_p1 = scmp.lt.s32.totalorder %s2716_s14, %s2716_s14 }
 0x4f2   :  { %p2923_p0 = scmp.ne.s32.totalorder %s2716_s14, %s2922_s5  ;;  %p2928_p2 = scmp.lt.s32.totalorder %s2922_s5, %s2922_s5 }
 0x4f3   :  { %v2271_v17 = vsel %vm2110_vm8, %v2270_v46, %v2266_v63 }
 0x4f4   :  { %v2276_v14 = vsel %vm2117_vm11, %v2275_v50, %v2271_v17  ;;  %v1818_v10 = vpop.permute.xlu1 %1817  ;;  %1997 = vperm.xlu1 %2921, %v1492_v54   ;;  %v1851_v22 = vpop.permute.xlu0 %1850  ;;  %v5175_v54 = vld [vmem:[#allocation10_spill] sm:$0xff]  ;;  %p2929_p3 = por %p2928_p2, %p2927_p1 }
 0x4f5   :  { %v4866_v23 = vsel %vm420_vm7, %v2276_v14, %v2672_v11  ;;  %v2359_v21 = vrot.slane %v1818_v10, %v4573_v33  ;;  %1964 = vperm.xlu0 %2920, %v1481_v25   ;;  %v1486_v50 = vadd.f32 %v4785_v30, %v5175_v54  ;;  %v2403_v11 = vrot.slane %v1845_v57, %v4659_v4  ;;  %v5176_v14 = vld [vmem:[#allocation15_spill] sm:$0xff]  ;;  %vm5182_vm7 = vmmov %vm5178_vm6 }
 0x4f6   :  { %v1487_v10 = vadd.f32 %v4785_v30, %v5176_v14  ;;  %v2413_v20 = vrot.slane %v1851_v22, %v4674_v29  ;;  %p2930_p4 = pnand %p2929_p3, %p2923_p0 }
 0x4f7   :  { %v2364_v47 = vsel %vm2019_vm13, %v2363_v52, %v2359_v21 }
 0x4f8   :  { %v1824_v12 = vpop.permute.xlu1 %1823  ;;  %2000 = vperm.xlu1 %2921, %v1493_v34   ;;  %v1857_v44 = vpop.permute.xlu0 %1856 }
 0x4f9   :  { %v2368_v19 = vrot.slane %v1824_v12, %v4587_v35  ;;  %1967 = vperm.xlu0 %2920, %v1482_v37   ;;  %v5177_v37 = vld [vmem:[#allocation29_spill] sm:$0xff] }
 0x4fb   :  { %v2369_v32 = vsel %vm2026_vm14, %v2368_v19, %v2364_v47  ;;  %v1488_v47 = vadd.f32 %v4785_v30, %v5177_v37 }
 0x4fc   :  { %v1830_v3 = vpop.permute.xlu1 %1829  ;;  %v2374_v28 = vsel %vm2033_vm15, %v2373_v31, %v2369_v32  ;;  %2003 = vperm.xlu1 %2921, %v1494_v27   ;;  %v1863_v45 = vpop.permute.xlu0 %1862  ;;  %v2423_v31 = vrot.slane %v1857_v44, %v4696_v61 }
 0x4fd   :  { %v2378_v36 = vrot.slane %v1830_v3, %v4604_v58  ;;  %1970 = vperm.xlu0 %2920, %v1483_v62  }
 0x4ff   :  { %v2379_v63 = vsel %vm2040_vm0, %v2378_v36, %v2374_v28  ;;  %v2433_v36 = vrot.slane %v1863_v45, %v4833_v6 }
 0x500   :  { %v1836_v8 = vpop.permute.xlu1 %1835  ;;  %v2384_v15 = vsel %vm2047_vm1, %v2383_v9, %v2379_v63  ;;  %2695 = vperm.xlu1 %2921, %v2692_v56   ;;  %v1773_v41 = vpop.permute.xlu0 %1772  ;;  %v1479_v56 = vadd.f32 %v4633_v53, %v5180_v5 }
 0x501   :  { %v2388_v46 = vrot.slane %v1836_v8, %v4624_v1  ;;  %1976 = vperm.xlu0 %2920, %v1485_v49   ;;  %v2284_v63 = vrot.slane %v1773_v41, %v4580_v42 }
 0x503   :  { %v2389_v60 = vsel %vm2054_vm2, %v2388_v46, %v2384_v15  ;;  %v5181_v15 = vld [vmem:[#allocation31_spill] sm:$0xff] }
 0x504   :  { %v1842_v48 = vpop.permute.xlu1 %1841  ;;  %v2394_v25 = vsel %vm2061_vm3, %v2393_v43, %v2389_v60  ;;  %v1779_v24 = vpop.permute.xlu0 %1778  ;;  %v1495_v46 = vadd.f32 %v4785_v30, %v5181_v15 }
 0x505   :  { %v2398_v17 = vrot.slane %v1842_v48, %v4646_v13  ;;  %1979 = vperm.xlu0 %2920, %v1486_v50   ;;  %v2294_v50 = vrot.slane %v1779_v24, %v4597_v40 }
 0x507   :  { %v2399_v52 = vsel %vm2068_vm4, %v2398_v17, %v2394_v25 }
 0x508   :  { %v1848_v26 = vpop.permute.xlu1 %1847  ;;  %v2404_v21 = vsel %vm2075_vm5, %v2403_v11, %v2399_v52  ;;  %v1785_v59 = vpop.permute.xlu0 %1784 }
 0x509   :  { %v2408_v34 = vrot.slane %v1848_v26, %v4665_v55  ;;  %1982 = vperm.xlu0 %2920, %v1487_v10   ;;  %v2304_v11 = vrot.slane %v1785_v59, %v4617_v51 }
 0x50b   :  { %v2409_v12 = vsel %vm2082_vm12, %v2408_v34, %v2404_v21 }
 0x50c   :  { %v1854_v57 = vpop.permute.xlu1 %1853  ;;  %v2414_v19 = vsel %vm5178_vm6, %v2413_v20, %v2409_v12  ;;  %v1791_v2 = vpop.permute.xlu0 %1790  ;;  %vm5183_vm6 = vcmask 1043459  }
 0x50d   :  { %v2418_v27 = vrot.slane %v1854_v57, %v4684_v0  ;;  %1985 = vperm.xlu0 %2920, %v1488_v47   ;;  %v2314_v24 = vrot.slane %v1791_v2, %v4640_v16 }
 0x50f   :  { %v2419_v62 = vsel %vm2096_vm10, %v2418_v27, %v2414_v19 }
 0x510   :  { %v1860_v22 = vpop.permute.xlu1 %1859  ;;  %v2424_v32 = vsel %vm2103_vm9, %v2423_v31, %v2419_v62  ;;  %v1797_v3 = vpop.permute.xlu0 %1796 }
 0x511   :  { %v2428_v28 = vrot.slane %v1860_v22, %v4702_v38  ;;  %1991 = vperm.xlu0 %2920, %v1490_v39   ;;  %v2324_v59 = vrot.slane %v1797_v3, %v4659_v4 }
 0x513   :  { %v2429_v9 = vsel %vm2110_vm8, %v2428_v28, %v2424_v32 }
 0x514   :  { %v2434_v44 = vsel %vm2117_vm11, %v2433_v36, %v2429_v9  ;;  %v1770_v18 = vpop.permute.xlu1 %1769  ;;  %v1803_v49 = vpop.permute.xlu0 %1802 }
 0x515   :  { %v2280_v8 = vrot.slane %v1770_v18, %v4573_v33  ;;  %1958 = vperm.xlu0 %2920, %v1479_v56   ;;  %v2334_v2 = vrot.slane %v1803_v49, %v4674_v29 }
 0x517   :  { %v2285_v43 = vsel %vm2019_vm13, %v2284_v63, %v2280_v8 }
 0x518   :  { %v1776_v45 = vpop.permute.xlu1 %1775  ;;  %v1809_v54 = vpop.permute.xlu0 %1808 }
 0x519   :  { %v2289_v53 = vrot.slane %v1776_v45, %v4587_v35  ;;  %2006 = vperm.xlu0 %2920, %v1495_v46   ;;  %v2344_v3 = vrot.slane %v1809_v54, %v4696_v61 }
 0x51b   :  { %v2290_v60 = vsel %vm2026_vm14, %v2289_v53, %v2285_v43 }
 0x51c   :  { %v1782_v48 = vpop.permute.xlu1 %1781  ;;  %v2295_v41 = vsel %vm2033_vm15, %v2294_v50, %v2290_v60  ;;  %v1815_v25 = vpop.permute.xlu0 %1814 }
 0x51d   :  { %v2299_v17 = vrot.slane %v1782_v48, %v4604_v58  ;;  %v2354_v18 = vrot.slane %v1815_v25, %v4833_v6 }
 0x51f   :  { %v2300_v30 = vsel %vm2040_vm0, %v2299_v17, %v2295_v41 }
 0x520   :  { %v1788_v14 = vpop.permute.xlu1 %1787  ;;  %v2305_v10 = vsel %vm2047_vm1, %v2304_v11, %v2300_v30  ;;  %v1869_v52 = vpop.permute.xlu0 %1868 }
 0x521   :  { %v2309_v26 = vrot.slane %v1788_v14, %v4624_v1  ;;  %v2442_v46 = vrot.slane %v1869_v52, %v4580_v42 }
 0x523   :  { %v2310_v21 = vsel %vm2054_vm2, %v2309_v26, %v2305_v10 }
 0x524   :  { %v1794_v34 = vpop.permute.xlu1 %1793  ;;  %v2315_v20 = vsel %vm2061_vm3, %v2314_v24, %v2310_v21  ;;  %v1875_v37 = vpop.permute.xlu0 %1874 }
 0x525   :  { %v2319_v47 = vrot.slane %v1794_v34, %v4646_v13  ;;  %v2452_v41 = vrot.slane %v1875_v37, %v4597_v40 }
 0x527   :  { %v2320_v12 = vsel %vm2068_vm4, %v2319_v47, %v2315_v20 }
 0x528   :  { %v1800_v57 = vpop.permute.xlu1 %1799  ;;  %v2325_v19 = vsel %vm2075_vm5, %v2324_v59, %v2320_v12  ;;  %v1881_v27 = vpop.permute.xlu0 %1880 }
 0x529   :  { %v2329_v31 = vrot.slane %v1800_v57, %v4665_v55  ;;  %v2462_v14 = vrot.slane %v1881_v27, %v4617_v51 }
 0x52b   :  { %v2330_v7 = vsel %vm2082_vm12, %v2329_v31, %v2325_v19 }
 0x52c   :  { %v1806_v39 = vpop.permute.xlu1 %1805  ;;  %v2335_v62 = vsel %vm5182_vm7, %v2334_v2, %v2330_v7  ;;  %v1887_v22 = vpop.permute.xlu0 %1886  ;;  %vm5184_vm7 = vcmask 1044484  }
 0x52d   :  { %v2339_v32 = vrot.slane %v1806_v39, %v4684_v0  ;;  %v2472_v21 = vrot.slane %v1887_v22, %v4640_v16 }
 0x52f   :  { %v2340_v28 = vsel %vm2096_vm10, %v2339_v32, %v2335_v62 }
 0x530   :  { %v1812_v36 = vpop.permute.xlu1 %1811  ;;  %v2345_v5 = vsel %vm2103_vm9, %v2344_v3, %v2340_v28  ;;  %v1893_v56 = vpop.permute.xlu0 %1892 }
 0x531   :  { %v2349_v9 = vrot.slane %v1812_v36, %v4702_v38  ;;  %v2482_v12 = vrot.slane %v1893_v56, %v4659_v4 }
 0x533   :  { %v2350_v49 = vsel %vm2110_vm8, %v2349_v9, %v2345_v5 }
 0x534   :  { %v2355_v63 = vsel %vm2117_vm11, %v2354_v18, %v2350_v49  ;;  %v1866_v8 = vpop.permute.xlu1 %1865  ;;  %v1899_v15 = vpop.permute.xlu0 %1898 }
 0x535   :  { %v2674_v43 = vsel %vm5183_vm6, %v2355_v63, %v4866_v23  ;;  %v2438_v45 = vrot.slane %v1866_v8, %v4573_v33  ;;  %v2492_v7 = vrot.slane %v1899_v15, %v4674_v29  ;;  %vm5185_vm6 = vcmask 786112  }
 0x536   :  { %v2675_v54 = vsel %vm5184_vm7, %v2434_v44, %v2674_v43  ;;  %vm5186_vm7 = vcmask 1045509  }
 0x537   :  { %v2443_v53 = vsel %vm2019_vm13, %v2442_v46, %v2438_v45 }
 0x538   :  { %v1872_v50 = vpop.permute.xlu1 %1871  ;;  %v1905_v60 = vpop.permute.xlu0 %1904 }
 0x539   :  { %v2447_v48 = vrot.slane %v1872_v50, %v4587_v35  ;;  %v2502_v28 = vrot.slane %v1905_v60, %v4696_v61 }
 0x53b   :  { %v2448_v25 = vsel %vm2026_vm14, %v2447_v48, %v2443_v53 }
 0x53c   :  { %v1878_v17 = vpop.permute.xlu1 %1877  ;;  %v2453_v11 = vsel %vm2033_vm15, %v2452_v41, %v2448_v25  ;;  %v1911_v30 = vpop.permute.xlu0 %1910 }
 0x53d   :  { %v2457_v23 = vrot.slane %v1878_v17, %v4604_v58  ;;  %v2512_v49 = vrot.slane %v1911_v30, %v4833_v6 }
 0x53f   :  { %v2458_v44 = vsel %vm2040_vm0, %v2457_v23, %v2453_v11 }
 0x540   :  { %v1884_v10 = vpop.permute.xlu1 %1883  ;;  %v2463_v52 = vsel %vm2047_vm1, %v2462_v14, %v2458_v44  ;;  %v1917_v26 = vpop.permute.xlu0 %1916 }
 0x541   :  { %v2467_v24 = vrot.slane %v1884_v10, %v4624_v1  ;;  %v2521_v53 = vrot.slane %v1917_v26, %v4580_v42 }
 0x543   :  { %v2468_v34 = vsel %vm2054_vm2, %v2467_v24, %v2463_v52 }
 0x544   :  { %v1890_v20 = vpop.permute.xlu1 %1889  ;;  %v2473_v37 = vsel %vm2061_vm3, %v2472_v21, %v2468_v34  ;;  %v1923_v47 = vpop.permute.xlu0 %1922 }
 0x545   :  { %v2477_v59 = vrot.slane %v1890_v20, %v4646_v13  ;;  %v2531_v41 = vrot.slane %v1923_v47, %v4597_v40 }
 0x547   :  { %v2478_v57 = vsel %vm2068_vm4, %v2477_v59, %v2473_v37 }
 0x548   :  { %v1896_v19 = vpop.permute.xlu1 %1895  ;;  %v2483_v27 = vsel %vm2075_vm5, %v2482_v12, %v2478_v57  ;;  %v1929_v31 = vpop.permute.xlu0 %1928 }
 0x549   :  { %v2487_v2 = vrot.slane %v1896_v19, %v4665_v55  ;;  %v2541_v14 = vrot.slane %v1929_v31, %v4617_v51 }
 0x54b   :  { %v2488_v39 = vsel %vm2082_vm12, %v2487_v2, %v2483_v27 }
 0x54c   :  { %v1902_v62 = vpop.permute.xlu1 %1901  ;;  %v2493_v22 = vsel %vm5185_vm6, %v2492_v7, %v2488_v39  ;;  %v1935_v32 = vpop.permute.xlu0 %1934 }
 0x54d   :  { %v2497_v3 = vrot.slane %v1902_v62, %v4684_v0  ;;  %v2551_v39 = vrot.slane %v1935_v32, %v4640_v16 }
 0x54f   :  { %v2498_v36 = vsel %vm2096_vm10, %v2497_v3, %v2493_v22 }
 0x550   :  { %v1908_v5 = vpop.permute.xlu1 %1907  ;;  %v2503_v56 = vsel %vm2103_vm9, %v2502_v28, %v2498_v36  ;;  %v1938_v9 = vpop.permute.xlu0 %1937 }
 0x551   :  { %v2507_v18 = vrot.slane %v1908_v5, %v4702_v38  ;;  %v2556_v28 = vrot.slane %v1938_v9, %v4646_v13 }
 0x553   :  { %v2508_v63 = vsel %vm2110_vm8, %v2507_v18, %v2503_v56 }
 0x554   :  { %v2513_v8 = vsel %vm2117_vm11, %v2512_v49, %v2508_v63  ;;  %v1914_v15 = vpop.permute.xlu1 %1913  ;;  %v1941_v46 = vpop.permute.xlu0 %1940 }
 0x555   :  { %v4993_v43 = vsel %vm5186_vm7, %v2513_v8, %v2675_v54  ;;  %v2517_v45 = vrot.slane %v1914_v15, %v4573_v33 }
 0x557   :  { %v2522_v25 = vsel %vm2019_vm13, %v2521_v53, %v2517_v45 }
 0x558   :  { %v1920_v50 = vpop.permute.xlu1 %1919  ;;  %v4997_v60 = vpop.permute.xlu0 %1943 }
 0x559   :  { %v2526_v48 = vrot.slane %v1920_v50, %v4587_v35 }
 0x55b   :  { %v2527_v17 = vsel %vm2026_vm14, %v2526_v48, %v2522_v25 }
 0x55c   :  { %v1926_v11 = vpop.permute.xlu1 %1925  ;;  %v2532_v30 = vsel %vm2033_vm15, %v2531_v41, %v2527_v17  ;;  %v1947_v54 = vpop.permute.xlu0 %1946 }
 0x55d   :  { %v2536_v23 = vrot.slane %v1926_v11, %v4604_v58 }
 0x55f   :  { %v2537_v44 = vsel %vm2040_vm0, %v2536_v23, %v2532_v30 }
 0x560   :  { %v1932_v10 = vpop.permute.xlu1 %1931  ;;  %v2542_v52 = vsel %vm2047_vm1, %v2541_v14, %v2537_v44  ;;  %v1950_v26 = vpop.permute.xlu0 %1949 }
 0x561   :  { %v2546_v27 = vrot.slane %v1932_v10, %v4624_v1 }
 0x563   :  { %v2547_v7 = vsel %vm2054_vm2, %v2546_v27, %v2542_v52 }
 0x564   :  { %v1974_v24 = vpop.permute.xlu1 %1973  ;;  %v5008_v21 = vpop.permute.xlu0 %1952  ;;  %v2552_v3 = vsel %vm2061_vm3, %v2551_v39, %v2547_v7 }
 0x568   :  { %v5010_v34 = vpop.permute.xlu1 %1988  ;;  %v5012_v20 = vpop.permute.xlu0 %1955 }
 0x56c   :  { %v5014_v37 = vpop.permute.xlu1 %1994  ;;  %v1962_v47 = vpop.permute.xlu0 %1961 }
 0x570   :  { %v5016_v59 = vpop.permute.xlu1 %1997  ;;  %v1965_v12 = vpop.permute.xlu0 %1964 }
 0x571   :  { %v2600_v36 = vrot.slane %v1965_v12, %v4580_v42 }
 0x574   :  { %v5018_v57 = vpop.permute.xlu1 %2000  ;;  %v1968_v19 = vpop.permute.xlu0 %1967 }
 0x578   :  { %v5021_v31 = vpop.permute.xlu1 %2003  ;;  %v1971_v2 = vpop.permute.xlu0 %1970 }
 0x57c   :  { %v2696_v62 = vpop.permute.xlu1 %2695  ;;  %v1977_v22 = vpop.permute.xlu0 %1976 }
 0x57d   :  { %2698 = vst [vmem:[#allocation4] sm:$0xff] %v2696_v62 }
 0x57e   :  { %2933 = shalt.err (!%p2930_p4)
}
 0x57f   :  { %2718 = dma.vmem_to_hbm [thread:$0]  %s2716_s14, 128, %s5098_s8, [#allocation5]   ;;  %v2605_v32 = vrot.slane %v1968_v19, %v4587_v35  ;;  %v2557_v5 = vsel %vm2068_vm4, %v2556_v28, %v2552_v3  ;;  %v2596_v56 = vrot.slane %v1962_v47, %v4573_v33  ;;  %v2610_v9 = vrot.slane %v1971_v2, %v4597_v40 }
 0x580   :  { %v1980_v42 = vpop.permute.xlu0 %1979  ;;  %v2561_v18 = vrot.slane %v1941_v46, %v4659_v4  ;;  %v2566_v15 = vrot.slane %v4997_v60, %v4665_v55  ;;  %v2620_v45 = vrot.slane %v1977_v22, %v4617_v51  ;;  %v2615_v33 = vrot.slane %v1974_v24, %v4604_v58  ;;  %s2973_s8 = smov [#allocation2]  }
 0x581   :  { %v2601_v49 = vsel %vm2019_vm13, %v2600_v36, %v2596_v56  ;;  %v2625_v40 = vrot.slane %v1980_v42, %v4624_v1  ;;  %v2571_v48 = vrot.slane %v1947_v54, %v4674_v29  ;;  %vm5187_vm13 = vmmov %vm5185_vm6  ;;  %v2576_v58 = vrot.slane %v1950_v26, %v4684_v0  ;;  %s2705_s16 = sshll.u32 %s2973_s8, 4  ;;  %s2706_s16 = int_to_ptr.vmem [resolvable:$true] %s2705_s16 }
 0x582   :  { %v2562_v63 = vsel %vm2075_vm5, %v2561_v18, %v2557_v5  ;;  %v2606_v8 = vsel %vm2026_vm14, %v2605_v32, %v2601_v49  ;;  %v2640_v54 = vrot.slane %v5010_v34, %v4659_v4  ;;  %v2581_v14 = vrot.slane %v5008_v21, %v4696_v61  ;;  %vm5188_vm14 = vmmov %vm5185_vm6  ;;  %s2942_s17 = scalar_lea.vmem %s2706_s16, 128  ;;  %p2947_p6 = scmp.lt.s32.totalorder %s2706_s16, %s2706_s16 }
 0x583   :  { %v2611_v35 = vsel %vm2033_vm15, %v2610_v9, %v2606_v8  ;;  %v2567_v46 = vsel %vm2082_vm12, %v2566_v15, %v2562_v63  ;;  %v2650_v10 = vrot.slane %v5014_v37, %v4674_v29  ;;  %v2655_v24 = vrot.slane %v5016_v59, %v4684_v0  ;;  %p2943_p5 = scmp.ne.s32.totalorder %s2706_s16, %s2942_s17  ;;  %p2948_p7 = scmp.lt.s32.totalorder %s2942_s17, %s2942_s17 }
 0x584   :  { %v1983_v53 = vpop.permute.xlu0 %1982  ;;  %v2616_v41 = vsel %vm2040_vm0, %v2615_v33, %v2611_v35  ;;  %v2572_v17 = vsel %vm5187_vm13, %v2571_v48, %v2567_v46  ;;  %v2665_v0 = vrot.slane %v5021_v31, %v4702_v38 }
 0x585   :  { %v2630_v50 = vrot.slane %v1983_v53, %v4640_v16  ;;  %v2621_v25 = vsel %vm2047_vm1, %v2620_v45, %v2616_v41  ;;  %v2577_v16 = vsel %vm2096_vm10, %v2576_v58, %v2572_v17  ;;  %p2949_p8 = por %p2948_p7, %p2947_p6 }
 0x586   :  { %v2626_v51 = vsel %vm2054_vm2, %v2625_v40, %v2621_v25  ;;  %v2582_v26 = vsel %vm2103_vm9, %v2581_v14, %v2577_v16 }
 0x587   :  { %v2631_v1 = vsel %vm2061_vm3, %v2630_v50, %v2626_v51  ;;  %p2950_p9 = pnand %p2949_p8, %p2943_p5 }
 0x588   :  { %v1986_v60 = vpop.permute.xlu0 %1985 }
 0x589   :  { %v2635_v11 = vrot.slane %v1986_v60, %v4646_v13  ;;  %v2586_v13 = vrot.slane %v5012_v20, %v4702_v38 }
 0x58b   :  { %v2636_v30 = vsel %vm2068_vm4, %v2635_v11, %v2631_v1  ;;  %v2587_v29 = vsel %vm2110_vm8, %v2586_v13, %v2582_v26 }
 0x58c   :  { %v1992_v23 = vpop.permute.xlu0 %1991  ;;  %v2641_v52 = vsel %vm2075_vm5, %v2640_v54, %v2636_v30 }
 0x58d   :  { %v2645_v44 = vrot.slane %v1992_v23, %v4665_v55  ;;  %v2660_v55 = vrot.slane %v5018_v57, %v4696_v61 }
 0x58f   :  { %v2646_v4 = vsel %vm2082_vm12, %v2645_v44, %v2641_v52  ;;  %vm5189_vm12 = vcmask 1046534  }
 0x590   :  { %v2651_v34 = vsel %vm5188_vm14, %v2650_v10, %v2646_v4  ;;  %v1959_v21 = vpop.permute.xlu0 %1958 }
 0x591   :  { %v2656_v20 = vsel %vm2096_vm10, %v2655_v24, %v2651_v34  ;;  %v2591_v47 = vrot.slane %v1959_v21, %v4833_v6  ;;  %vm5190_vm10 = vcmask 1047559  }
 0x592   :  { %v2661_v12 = vsel %vm2103_vm9, %v2660_v55, %v2656_v20 }
 0x593   :  { %v2592_v37 = vsel %vm2117_vm11, %v2591_v47, %v2587_v29  ;;  %v2666_v57 = vsel %vm2110_vm8, %v2665_v0, %v2661_v12 }
 0x594   :  { %v2007_v59 = vpop.permute.xlu0 %2006  ;;  %v2677_v19 = vsel %vm5189_vm12, %v2592_v37, %v4993_v43 }
 0x595   :  { %v2670_v61 = vrot.slane %v2007_v59, %v4833_v6 }
 0x597   :  { %v2671_v27 = vsel %vm2117_vm11, %v2670_v61, %v2666_v57 }
 0x598   :  { %v2678_v2 = vsel %vm5190_vm10, %v2671_v27, %v2677_v19 }
 0x599   :  { %2680 = vst [vmem:[#allocation2] sm:$0xff] %v2678_v2 }
 0x59a   :  { %2953 = shalt.err (!%p2950_p9)
}
 0x59b   :  { %2708 = dma.vmem_to_hbm [thread:$0]  %s2706_s16, 128, %s5097_s7, [#allocation3]  }
 0x59c   :  { %2962 = dma.done.wait [#allocation3], 128  }
 0x59d   :  { %2963 = vsyncadd [#allocation3], 4294967168 }
 0x59e   :  { %2964 = dma.done.wait [#allocation5], 128  }
 0x59f   :  { %2965 = vsyncadd [#allocation5], 4294967168 }
 0x5a0   :  { %2725 = vsyncpa [#allocation3], 1 }
 0x5a1   :  { %2726 = vsyncpa [#allocation5], 1 }

</bundles_post_ra>
